<compile_context>
chip_gen: v5e
topology: v5e:2x2
jax: 0.10.0
libtpu: 0.0.40
codegen_flags: <defaults>
</compile_context>

<pallas_src>
import jax
import jax.numpy as jnp
import numpy as np
from jax.experimental import pallas as pl
from jax.experimental.pallas import tpu as pltpu

H = 50       # logical hidden size (nn.LSTM hidden_size=50)
HP = 128     # lane-padded hidden size
OUT = 3      # fc output features
OUTP = 128   # lane-padded fc output width (sliced back to OUT in the wrapper)

# Kernel-internal gate order: i, f, o (sigmoid, contiguous), g (tanh).
# PyTorch stacks gates as i, f, g, o  ->  permutation below.
_GATE_PERM = np.array([0, 1, 3, 2])


def _sigmoid(x):
    # One EUP tanh instead of exp + reciprocal (shorter serial chain).
    return 0.5 * jnp.tanh(0.5 * x) + 0.5


def lstm_kernel(x_ref, wih_ref, b_ref, whh_ref, fcw_ref, fcb_ref, out_ref):
    """Whole forward in one invocation; h/c carried in vregs across time."""
    T, B, _ = x_ref.shape
    wih = wih_ref[...]    # (1, 4*HP) f32   (input-size==1 row of W_ih^T)
    bias = b_ref[...]     # (1, 4*HP) f32   (b_ih + b_hh, padded, reordered)

    def step(t, carry):
        h, c = carry
        # Recurrent projection on the MXU (bf16 operands, f32 accumulation)
        # plus the in-kernel input projection on the VPU.
        gates = (jnp.dot(h.astype(jnp.bfloat16), whh_ref[...],
                         preferred_element_type=jnp.float32)
                 + x_ref[t] * wih + bias)              # (B, 4*HP), order i,f,o,g
        sg = _sigmoid(gates[:, :3 * HP])               # one sigmoid over i,f,o
        i = sg[:, 0 * HP:1 * HP]
        f = sg[:, 1 * HP:2 * HP]
        o = sg[:, 2 * HP:3 * HP]
        g = jnp.tanh(gates[:, 3 * HP:4 * HP])
        c_new = f * c + i * g
        h_new = o * jnp.tanh(c_new)
        return (h_new, c_new)

    h0 = jnp.zeros((B, HP), jnp.float32)
    c0 = jnp.zeros((B, HP), jnp.float32)
    h_final, _ = jax.lax.fori_loop(0, T, step, (h0, c0), unroll=True)

    # Final FC on the last hidden state; lane-padded output (cols >= OUT are 0).
    out_ref[...] = (jnp.dot(h_final.astype(jnp.bfloat16), fcw_ref[...],
                            preferred_element_type=jnp.float32)
                    + fcb_ref[...])


def _pad_gate_weight(w):
    """(4H, K) PyTorch gate-stacked weight -> (K, 4*HP):
    gates reordered i,f,o,g and each gate's H outputs zero-padded to HP."""
    k = w.shape[1]
    wr = jnp.asarray(w, jnp.float32).reshape(4, H, k)[_GATE_PERM]
    wp = jnp.zeros((4, HP, k), jnp.float32).at[:, :H, :].set(wr)
    return wp.reshape(4 * HP, k).T


def prepare_params(w_ih, w_hh, b_ih, b_hh, fc_w, fc_b):
    """One-time per-model weight preparation (hoisted out of the call path)."""
    wih_row = _pad_gate_weight(w_ih).reshape(1, 4 * HP)                   # (1, 512)  f32
    whh_t = (jnp.zeros((HP, 4 * HP), jnp.float32)
             .at[:H, :].set(_pad_gate_weight(w_hh))
             .astype(jnp.bfloat16))                                        # (128, 512) bf16
    b = (b_ih + b_hh).reshape(4, H)[_GATE_PERM]
    b_row = jnp.zeros((4, HP), jnp.float32).at[:, :H].set(b).reshape(1, 4 * HP)
    fcw_p = (jnp.zeros((HP, OUTP), jnp.float32)
             .at[:H, :OUT].set(fc_w.T)
             .astype(jnp.bfloat16))                                        # (128, 128) bf16
    fcb_p = jnp.zeros((1, OUTP), jnp.float32).at[0, :OUT].set(fc_b)        # (1, 128)  f32
    # Force materialization once, outside the jitted forward.
    return tuple(jax.block_until_ready(p)
                 for p in (wih_row, b_row, whh_t, fcw_p, fcb_p))


@jax.jit
def lstm_model_forward(x, wih_row, b_row, whh_t, fcw_p, fcb_p):
    """Pallas implementation of LSTMModel.forward.  x: (B, T, 1) float32."""
    B, T, _ = x.shape
    x_tb = jnp.transpose(x, (1, 0, 2)).astype(jnp.float32)   # (T, B, 1), tiny

    # Advisory cost estimate so XLA schedules the surrounding tiny ops tightly.
    flops = 2 * T * B * HP * (4 * HP) + 2 * B * HP * OUTP
    transcendentals = T * B * 5 * HP
    bytes_accessed = (x_tb.size + wih_row.size + b_row.size + fcb_p.size
                      + B * OUTP) * 4 + (whh_t.size + fcw_p.size) * 2

    out_p = pl.pallas_call(
        lstm_kernel,
        out_shape=jax.ShapeDtypeStruct((B, OUTP), jnp.float32),
        in_specs=[
            pl.BlockSpec(memory_space=pltpu.MemorySpace.VMEM),  # x       (T,B,1)     f32
            pl.BlockSpec(memory_space=pltpu.MemorySpace.VMEM),  # wih_row (1,4*HP)    f32
            pl.BlockSpec(memory_space=pltpu.MemorySpace.VMEM),  # b_row   (1,4*HP)    f32
            pl.BlockSpec(memory_space=pltpu.MemorySpace.VMEM),  # W_hh^T  (HP,4*HP)   bf16
            pl.BlockSpec(memory_space=pltpu.MemorySpace.VMEM),  # fc_w^T  (HP,OUTP)   bf16
            pl.BlockSpec(memory_space=pltpu.MemorySpace.VMEM),  # fc_b    (1,OUTP)    f32
        ],
        out_specs=pl.BlockSpec(memory_space=pltpu.MemorySpace.VMEM),
        cost_estimate=pl.CostEstimate(flops=flops,
                                      transcendentals=transcendentals,
                                      bytes_accessed=bytes_accessed),
    )(x_tb, wih_row, b_row, whh_t, fcw_p, fcb_p)
    return out_p[:, :OUT]


def reference_forward(x, w_ih, w_hh, b_ih, b_hh, fc_w, fc_b):
    """Pure-JAX (f32) replica of the PyTorch forward, for correctness check."""
    B = x.shape[0]
    h0 = jnp.zeros((B, H), jnp.float32)
    c0 = jnp.zeros((B, H), jnp.float32)

    def step(carry, x_t):
        h, c = carry
        gates = x_t @ w_ih.T + h @ w_hh.T + b_ih + b_hh
        i, f, g, o = jnp.split(gates, 4, axis=-1)
        i = jax.nn.sigmoid(i)
        f = jax.nn.sigmoid(f)
        g = jnp.tanh(g)
        o = jax.nn.sigmoid(o)
        c = f * c + i * g
        h = o * jnp.tanh(c)
        return (h, c), None

    (h, _), _ = jax.lax.scan(step, (h0, c0), jnp.transpose(x, (1, 0, 2)))
    return h @ fc_w.T + fc_b


if __name__ == "__main__":
    B, T = 2, 8
    key = jax.random.PRNGKey(0)
    kx, k1, k2, k3, k4, k5, k6 = jax.random.split(key, 7)

    # Deterministic PyTorch-style uniform(-1/sqrt(H), 1/sqrt(H)) init.
    s = 1.0 / np.sqrt(H)
    w_ih = jax.random.uniform(k1, (4 * H, 1), jnp.float32, -s, s)
    w_hh = jax.random.uniform(k2, (4 * H, H), jnp.float32, -s, s)
    b_ih = jax.random.uniform(k3, (4 * H,), jnp.float32, -s, s)
    b_hh = jax.random.uniform(k4, (4 * H,), jnp.float32, -s, s)
    fc_w = jax.random.uniform(k5, (OUT, H), jnp.float32, -s, s)
    fc_b = jax.random.uniform(k6, (OUT,), jnp.float32, -s, s)

    x = jax.random.normal(kx, (B, T, 1), jnp.float32)

    # One-time weight prep (hoisted out of the per-call path).
    params = prepare_params(w_ih, w_hh, b_ih, b_hh, fc_w, fc_b)

    out = lstm_model_forward(x, *params)
    out = jax.block_until_ready(out)

    ref = reference_forward(x, w_ih, w_hh, b_ih, b_hh, fc_w, fc_b)
    # Tolerance loosened vs pure-f32 to cover the intentional bf16 MXU
    # operands (f32 accumulation); observed error is O(1e-3).
    np.testing.assert_allclose(np.asarray(out), np.asarray(ref),
                               rtol=1e-2, atol=1e-2)
    print("KERNEL_OK")
</pallas_src>

<mosaic_0001>
module attributes {stable_mosaic.version = 11 : i64} {
  func.func @lstm_kernel(%arg0: memref<8x2x1xf32, #tpu.memory_space<vmem>>, %arg1: memref<1x512xf32, #tpu.memory_space<vmem>>, %arg2: memref<1x512xf32, #tpu.memory_space<vmem>>, %arg3: memref<128x512xbf16, #tpu.memory_space<vmem>>, %arg4: memref<128x128xbf16, #tpu.memory_space<vmem>>, %arg5: memref<1x128xf32, #tpu.memory_space<vmem>>, %arg6: memref<2x128xf32, #tpu.memory_space<vmem>>) attributes {dimension_semantics = [], scalar_prefetch = 0 : i64, scratch_operands = 0 : i64, tpu.core_type = #tpu.core_type<tc>} {
    %c0 = arith.constant 0 : index
    %c0_0 = arith.constant 0 : index
    %0 = vector.load %arg1[%c0, %c0_0] : memref<1x512xf32, #tpu.memory_space<vmem>>, vector<1x512xf32>
    %c0_1 = arith.constant 0 : index
    %c0_2 = arith.constant 0 : index
    %1 = vector.load %arg2[%c0_1, %c0_2] : memref<1x512xf32, #tpu.memory_space<vmem>>, vector<1x512xf32>
    %cst = arith.constant 0.000000e+00 : f32
    %2 = vector.broadcast %cst : f32 to vector<2x128xf32>
    %cst_3 = arith.constant 0.000000e+00 : f32
    %3 = vector.broadcast %cst_3 : f32 to vector<2x128xf32>
    %c0_i32 = arith.constant 0 : i32
    %4 = arith.truncf %2 : vector<2x128xf32> to vector<2x128xbf16>
    %c0_4 = arith.constant 0 : index
    %c0_5 = arith.constant 0 : index
    %5 = vector.load %arg3[%c0_4, %c0_5] : memref<128x512xbf16, #tpu.memory_space<vmem>>, vector<128x512xbf16>
    %cst_6 = arith.constant dense<0.000000e+00> : vector<2x512xf32>
    %6 = tpu.matmul %4, %5, %cst_6 {dimension_numbers = #tpu.dot_dimension_numbers<[1], [0], [0], [1], [0, 0, 1, 1], [], []>} : vector<2x128xbf16>, vector<128x512xbf16>, vector<2x512xf32> -> vector<2x512xf32>
    %7 = arith.index_cast %c0_i32 : i32 to index
    %c0_7 = arith.constant 0 : index
    %c0_8 = arith.constant 0 : index
    %8 = vector.load %arg0[%7, %c0_7, %c0_8] : memref<8x2x1xf32, #tpu.memory_space<vmem>>, vector<1x2x1xf32>
    %9 = vector.shape_cast %8 : vector<1x2x1xf32> to vector<2x1xf32>
    %10 = vector.broadcast %9 : vector<2x1xf32> to vector<2x512xf32>
    %11 = vector.broadcast %0 : vector<1x512xf32> to vector<2x512xf32>
    %12 = arith.mulf %10, %11 : vector<2x512xf32>
    %13 = arith.addf %6, %12 : vector<2x512xf32>
    %14 = vector.broadcast %1 : vector<1x512xf32> to vector<2x512xf32>
    %15 = arith.addf %13, %14 : vector<2x512xf32>
    %16 = vector.extract_strided_slice %15 {offsets = [0, 0], sizes = [2, 384], strides = [1, 1]} : vector<2x512xf32> to vector<2x384xf32>
    %cst_9 = arith.constant 5.000000e-01 : f32
    %17 = vector.broadcast %cst_9 : f32 to vector<2x384xf32>
    %18 = arith.mulf %17, %16 : vector<2x384xf32>
    %19 = math.tanh %18 : vector<2x384xf32>
    %cst_10 = arith.constant 5.000000e-01 : f32
    %20 = vector.broadcast %cst_10 : f32 to vector<2x384xf32>
    %21 = arith.mulf %20, %19 : vector<2x384xf32>
    %cst_11 = arith.constant 5.000000e-01 : f32
    %22 = vector.broadcast %cst_11 : f32 to vector<2x384xf32>
    %23 = arith.addf %21, %22 : vector<2x384xf32>
    %24 = vector.extract_strided_slice %23 {offsets = [0, 0], sizes = [2, 128], strides = [1, 1]} : vector<2x384xf32> to vector<2x128xf32>
    %25 = vector.extract_strided_slice %23 {offsets = [0, 128], sizes = [2, 128], strides = [1, 1]} : vector<2x384xf32> to vector<2x128xf32>
    %26 = vector.extract_strided_slice %23 {offsets = [0, 256], sizes = [2, 128], strides = [1, 1]} : vector<2x384xf32> to vector<2x128xf32>
    %27 = vector.extract_strided_slice %15 {offsets = [0, 384], sizes = [2, 128], strides = [1, 1]} : vector<2x512xf32> to vector<2x128xf32>
    %28 = math.tanh %27 : vector<2x128xf32>
    %29 = arith.mulf %25, %3 : vector<2x128xf32>
    %30 = arith.mulf %24, %28 : vector<2x128xf32>
    %31 = arith.addf %29, %30 : vector<2x128xf32>
    %32 = math.tanh %31 : vector<2x128xf32>
    %33 = arith.mulf %26, %32 : vector<2x128xf32>
    %c1_i32 = arith.constant 1 : i32
    %34 = arith.truncf %33 : vector<2x128xf32> to vector<2x128xbf16>
    %c0_12 = arith.constant 0 : index
    %c0_13 = arith.constant 0 : index
    %35 = vector.load %arg3[%c0_12, %c0_13] : memref<128x512xbf16, #tpu.memory_space<vmem>>, vector<128x512xbf16>
    %cst_14 = arith.constant dense<0.000000e+00> : vector<2x512xf32>
    %36 = tpu.matmul %34, %35, %cst_14 {dimension_numbers = #tpu.dot_dimension_numbers<[1], [0], [0], [1], [0, 0, 1, 1], [], []>} : vector<2x128xbf16>, vector<128x512xbf16>, vector<2x512xf32> -> vector<2x512xf32>
    %37 = arith.index_cast %c1_i32 : i32 to index
    %c0_15 = arith.constant 0 : index
    %c0_16 = arith.constant 0 : index
    %38 = vector.load %arg0[%37, %c0_15, %c0_16] : memref<8x2x1xf32, #tpu.memory_space<vmem>>, vector<1x2x1xf32>
    %39 = vector.shape_cast %38 : vector<1x2x1xf32> to vector<2x1xf32>
    %40 = vector.broadcast %39 : vector<2x1xf32> to vector<2x512xf32>
    %41 = vector.broadcast %0 : vector<1x512xf32> to vector<2x512xf32>
    %42 = arith.mulf %40, %41 : vector<2x512xf32>
    %43 = arith.addf %36, %42 : vector<2x512xf32>
    %44 = vector.broadcast %1 : vector<1x512xf32> to vector<2x512xf32>
    %45 = arith.addf %43, %44 : vector<2x512xf32>
    %46 = vector.extract_strided_slice %45 {offsets = [0, 0], sizes = [2, 384], strides = [1, 1]} : vector<2x512xf32> to vector<2x384xf32>
    %cst_17 = arith.constant 5.000000e-01 : f32
    %47 = vector.broadcast %cst_17 : f32 to vector<2x384xf32>
    %48 = arith.mulf %47, %46 : vector<2x384xf32>
    %49 = math.tanh %48 : vector<2x384xf32>
    %cst_18 = arith.constant 5.000000e-01 : f32
    %50 = vector.broadcast %cst_18 : f32 to vector<2x384xf32>
    %51 = arith.mulf %50, %49 : vector<2x384xf32>
    %cst_19 = arith.constant 5.000000e-01 : f32
    %52 = vector.broadcast %cst_19 : f32 to vector<2x384xf32>
    %53 = arith.addf %51, %52 : vector<2x384xf32>
    %54 = vector.extract_strided_slice %53 {offsets = [0, 0], sizes = [2, 128], strides = [1, 1]} : vector<2x384xf32> to vector<2x128xf32>
    %55 = vector.extract_strided_slice %53 {offsets = [0, 128], sizes = [2, 128], strides = [1, 1]} : vector<2x384xf32> to vector<2x128xf32>
    %56 = vector.extract_strided_slice %53 {offsets = [0, 256], sizes = [2, 128], strides = [1, 1]} : vector<2x384xf32> to vector<2x128xf32>
    %57 = vector.extract_strided_slice %45 {offsets = [0, 384], sizes = [2, 128], strides = [1, 1]} : vector<2x512xf32> to vector<2x128xf32>
    %58 = math.tanh %57 : vector<2x128xf32>
    %59 = arith.mulf %55, %31 : vector<2x128xf32>
    %60 = arith.mulf %54, %58 : vector<2x128xf32>
    %61 = arith.addf %59, %60 : vector<2x128xf32>
    %62 = math.tanh %61 : vector<2x128xf32>
    %63 = arith.mulf %56, %62 : vector<2x128xf32>
    %c2_i32 = arith.constant 2 : i32
    %64 = arith.truncf %63 : vector<2x128xf32> to vector<2x128xbf16>
    %c0_20 = arith.constant 0 : index
    %c0_21 = arith.constant 0 : index
    %65 = vector.load %arg3[%c0_20, %c0_21] : memref<128x512xbf16, #tpu.memory_space<vmem>>, vector<128x512xbf16>
    %cst_22 = arith.constant dense<0.000000e+00> : vector<2x512xf32>
    %66 = tpu.matmul %64, %65, %cst_22 {dimension_numbers = #tpu.dot_dimension_numbers<[1], [0], [0], [1], [0, 0, 1, 1], [], []>} : vector<2x128xbf16>, vector<128x512xbf16>, vector<2x512xf32> -> vector<2x512xf32>
    %67 = arith.index_cast %c2_i32 : i32 to index
    %c0_23 = arith.constant 0 : index
    %c0_24 = arith.constant 0 : index
    %68 = vector.load %arg0[%67, %c0_23, %c0_24] : memref<8x2x1xf32, #tpu.memory_space<vmem>>, vector<1x2x1xf32>
    %69 = vector.shape_cast %68 : vector<1x2x1xf32> to vector<2x1xf32>
    %70 = vector.broadcast %69 : vector<2x1xf32> to vector<2x512xf32>
    %71 = vector.broadcast %0 : vector<1x512xf32> to vector<2x512xf32>
    %72 = arith.mulf %70, %71 : vector<2x512xf32>
    %73 = arith.addf %66, %72 : vector<2x512xf32>
    %74 = vector.broadcast %1 : vector<1x512xf32> to vector<2x512xf32>
    %75 = arith.addf %73, %74 : vector<2x512xf32>
    %76 = vector.extract_strided_slice %75 {offsets = [0, 0], sizes = [2, 384], strides = [1, 1]} : vector<2x512xf32> to vector<2x384xf32>
    %cst_25 = arith.constant 5.000000e-01 : f32
    %77 = vector.broadcast %cst_25 : f32 to vector<2x384xf32>
    %78 = arith.mulf %77, %76 : vector<2x384xf32>
    %79 = math.tanh %78 : vector<2x384xf32>
    %cst_26 = arith.constant 5.000000e-01 : f32
    %80 = vector.broadcast %cst_26 : f32 to vector<2x384xf32>
    %81 = arith.mulf %80, %79 : vector<2x384xf32>
    %cst_27 = arith.constant 5.000000e-01 : f32
    %82 = vector.broadcast %cst_27 : f32 to vector<2x384xf32>
    %83 = arith.addf %81, %82 : vector<2x384xf32>
    %84 = vector.extract_strided_slice %83 {offsets = [0, 0], sizes = [2, 128], strides = [1, 1]} : vector<2x384xf32> to vector<2x128xf32>
    %85 = vector.extract_strided_slice %83 {offsets = [0, 128], sizes = [2, 128], strides = [1, 1]} : vector<2x384xf32> to vector<2x128xf32>
    %86 = vector.extract_strided_slice %83 {offsets = [0, 256], sizes = [2, 128], strides = [1, 1]} : vector<2x384xf32> to vector<2x128xf32>
    %87 = vector.extract_strided_slice %75 {offsets = [0, 384], sizes = [2, 128], strides = [1, 1]} : vector<2x512xf32> to vector<2x128xf32>
    %88 = math.tanh %87 : vector<2x128xf32>
    %89 = arith.mulf %85, %61 : vector<2x128xf32>
    %90 = arith.mulf %84, %88 : vector<2x128xf32>
    %91 = arith.addf %89, %90 : vector<2x128xf32>
    %92 = math.tanh %91 : vector<2x128xf32>
    %93 = arith.mulf %86, %92 : vector<2x128xf32>
    %c3_i32 = arith.constant 3 : i32
    %94 = arith.truncf %93 : vector<2x128xf32> to vector<2x128xbf16>
    %c0_28 = arith.constant 0 : index
    %c0_29 = arith.constant 0 : index
    %95 = vector.load %arg3[%c0_28, %c0_29] : memref<128x512xbf16, #tpu.memory_space<vmem>>, vector<128x512xbf16>
    %cst_30 = arith.constant dense<0.000000e+00> : vector<2x512xf32>
    %96 = tpu.matmul %94, %95, %cst_30 {dimension_numbers = #tpu.dot_dimension_numbers<[1], [0], [0], [1], [0, 0, 1, 1], [], []>} : vector<2x128xbf16>, vector<128x512xbf16>, vector<2x512xf32> -> vector<2x512xf32>
    %97 = arith.index_cast %c3_i32 : i32 to index
    %c0_31 = arith.constant 0 : index
    %c0_32 = arith.constant 0 : index
    %98 = vector.load %arg0[%97, %c0_31, %c0_32] : memref<8x2x1xf32, #tpu.memory_space<vmem>>, vector<1x2x1xf32>
    %99 = vector.shape_cast %98 : vector<1x2x1xf32> to vector<2x1xf32>
    %100 = vector.broadcast %99 : vector<2x1xf32> to vector<2x512xf32>
    %101 = vector.broadcast %0 : vector<1x512xf32> to vector<2x512xf32>
    %102 = arith.mulf %100, %101 : vector<2x512xf32>
    %103 = arith.addf %96, %102 : vector<2x512xf32>
    %104 = vector.broadcast %1 : vector<1x512xf32> to vector<2x512xf32>
    %105 = arith.addf %103, %104 : vector<2x512xf32>
    %106 = vector.extract_strided_slice %105 {offsets = [0, 0], sizes = [2, 384], strides = [1, 1]} : vector<2x512xf32> to vector<2x384xf32>
    %cst_33 = arith.constant 5.000000e-01 : f32
    %107 = vector.broadcast %cst_33 : f32 to vector<2x384xf32>
    %108 = arith.mulf %107, %106 : vector<2x384xf32>
    %109 = math.tanh %108 : vector<2x384xf32>
    %cst_34 = arith.constant 5.000000e-01 : f32
    %110 = vector.broadcast %cst_34 : f32 to vector<2x384xf32>
    %111 = arith.mulf %110, %109 : vector<2x384xf32>
    %cst_35 = arith.constant 5.000000e-01 : f32
    %112 = vector.broadcast %cst_35 : f32 to vector<2x384xf32>
    %113 = arith.addf %111, %112 : vector<2x384xf32>
    %114 = vector.extract_strided_slice %113 {offsets = [0, 0], sizes = [2, 128], strides = [1, 1]} : vector<2x384xf32> to vector<2x128xf32>
    %115 = vector.extract_strided_slice %113 {offsets = [0, 128], sizes = [2, 128], strides = [1, 1]} : vector<2x384xf32> to vector<2x128xf32>
    %116 = vector.extract_strided_slice %113 {offsets = [0, 256], sizes = [2, 128], strides = [1, 1]} : vector<2x384xf32> to vector<2x128xf32>
    %117 = vector.extract_strided_slice %105 {offsets = [0, 384], sizes = [2, 128], strides = [1, 1]} : vector<2x512xf32> to vector<2x128xf32>
    %118 = math.tanh %117 : vector<2x128xf32>
    %119 = arith.mulf %115, %91 : vector<2x128xf32>
    %120 = arith.mulf %114, %118 : vector<2x128xf32>
    %121 = arith.addf %119, %120 : vector<2x128xf32>
    %122 = math.tanh %121 : vector<2x128xf32>
    %123 = arith.mulf %116, %122 : vector<2x128xf32>
    %c4_i32 = arith.constant 4 : i32
    %124 = arith.truncf %123 : vector<2x128xf32> to vector<2x128xbf16>
    %c0_36 = arith.constant 0 : index
    %c0_37 = arith.constant 0 : index
    %125 = vector.load %arg3[%c0_36, %c0_37] : memref<128x512xbf16, #tpu.memory_space<vmem>>, vector<128x512xbf16>
    %cst_38 = arith.constant dense<0.000000e+00> : vector<2x512xf32>
    %126 = tpu.matmul %124, %125, %cst_38 {dimension_numbers = #tpu.dot_dimension_numbers<[1], [0], [0], [1], [0, 0, 1, 1], [], []>} : vector<2x128xbf16>, vector<128x512xbf16>, vector<2x512xf32> -> vector<2x512xf32>
    %127 = arith.index_cast %c4_i32 : i32 to index
    %c0_39 = arith.constant 0 : index
    %c0_40 = arith.constant 0 : index
    %128 = vector.load %arg0[%127, %c0_39, %c0_40] : memref<8x2x1xf32, #tpu.memory_space<vmem>>, vector<1x2x1xf32>
    %129 = vector.shape_cast %128 : vector<1x2x1xf32> to vector<2x1xf32>
    %130 = vector.broadcast %129 : vector<2x1xf32> to vector<2x512xf32>
    %131 = vector.broadcast %0 : vector<1x512xf32> to vector<2x512xf32>
    %132 = arith.mulf %130, %131 : vector<2x512xf32>
    %133 = arith.addf %126, %132 : vector<2x512xf32>
    %134 = vector.broadcast %1 : vector<1x512xf32> to vector<2x512xf32>
    %135 = arith.addf %133, %134 : vector<2x512xf32>
    %136 = vector.extract_strided_slice %135 {offsets = [0, 0], sizes = [2, 384], strides = [1, 1]} : vector<2x512xf32> to vector<2x384xf32>
    %cst_41 = arith.constant 5.000000e-01 : f32
    %137 = vector.broadcast %cst_41 : f32 to vector<2x384xf32>
    %138 = arith.mulf %137, %136 : vector<2x384xf32>
    %139 = math.tanh %138 : vector<2x384xf32>
    %cst_42 = arith.constant 5.000000e-01 : f32
    %140 = vector.broadcast %cst_42 : f32 to vector<2x384xf32>
    %141 = arith.mulf %140, %139 : vector<2x384xf32>
    %cst_43 = arith.constant 5.000000e-01 : f32
    %142 = vector.broadcast %cst_43 : f32 to vector<2x384xf32>
    %143 = arith.addf %141, %142 : vector<2x384xf32>
    %144 = vector.extract_strided_slice %143 {offsets = [0, 0], sizes = [2, 128], strides = [1, 1]} : vector<2x384xf32> to vector<2x128xf32>
    %145 = vector.extract_strided_slice %143 {offsets = [0, 128], sizes = [2, 128], strides = [1, 1]} : vector<2x384xf32> to vector<2x128xf32>
    %146 = vector.extract_strided_slice %143 {offsets = [0, 256], sizes = [2, 128], strides = [1, 1]} : vector<2x384xf32> to vector<2x128xf32>
    %147 = vector.extract_strided_slice %135 {offsets = [0, 384], sizes = [2, 128], strides = [1, 1]} : vector<2x512xf32> to vector<2x128xf32>
    %148 = math.tanh %147 : vector<2x128xf32>
    %149 = arith.mulf %145, %121 : vector<2x128xf32>
    %150 = arith.mulf %144, %148 : vector<2x128xf32>
    %151 = arith.addf %149, %150 : vector<2x128xf32>
    %152 = math.tanh %151 : vector<2x128xf32>
    %153 = arith.mulf %146, %152 : vector<2x128xf32>
    %c5_i32 = arith.constant 5 : i32
    %154 = arith.truncf %153 : vector<2x128xf32> to vector<2x128xbf16>
    %c0_44 = arith.constant 0 : index
    %c0_45 = arith.constant 0 : index
    %155 = vector.load %arg3[%c0_44, %c0_45] : memref<128x512xbf16, #tpu.memory_space<vmem>>, vector<128x512xbf16>
    %cst_46 = arith.constant dense<0.000000e+00> : vector<2x512xf32>
    %156 = tpu.matmul %154, %155, %cst_46 {dimension_numbers = #tpu.dot_dimension_numbers<[1], [0], [0], [1], [0, 0, 1, 1], [], []>} : vector<2x128xbf16>, vector<128x512xbf16>, vector<2x512xf32> -> vector<2x512xf32>
    %157 = arith.index_cast %c5_i32 : i32 to index
    %c0_47 = arith.constant 0 : index
    %c0_48 = arith.constant 0 : index
    %158 = vector.load %arg0[%157, %c0_47, %c0_48] : memref<8x2x1xf32, #tpu.memory_space<vmem>>, vector<1x2x1xf32>
    %159 = vector.shape_cast %158 : vector<1x2x1xf32> to vector<2x1xf32>
    %160 = vector.broadcast %159 : vector<2x1xf32> to vector<2x512xf32>
    %161 = vector.broadcast %0 : vector<1x512xf32> to vector<2x512xf32>
    %162 = arith.mulf %160, %161 : vector<2x512xf32>
    %163 = arith.addf %156, %162 : vector<2x512xf32>
    %164 = vector.broadcast %1 : vector<1x512xf32> to vector<2x512xf32>
    %165 = arith.addf %163, %164 : vector<2x512xf32>
    %166 = vector.extract_strided_slice %165 {offsets = [0, 0], sizes = [2, 384], strides = [1, 1]} : vector<2x512xf32> to vector<2x384xf32>
    %cst_49 = arith.constant 5.000000e-01 : f32
    %167 = vector.broadcast %cst_49 : f32 to vector<2x384xf32>
    %168 = arith.mulf %167, %166 : vector<2x384xf32>
    %169 = math.tanh %168 : vector<2x384xf32>
    %cst_50 = arith.constant 5.000000e-01 : f32
    %170 = vector.broadcast %cst_50 : f32 to vector<2x384xf32>
    %171 = arith.mulf %170, %169 : vector<2x384xf32>
    %cst_51 = arith.constant 5.000000e-01 : f32
    %172 = vector.broadcast %cst_51 : f32 to vector<2x384xf32>
    %173 = arith.addf %171, %172 : vector<2x384xf32>
    %174 = vector.extract_strided_slice %173 {offsets = [0, 0], sizes = [2, 128], strides = [1, 1]} : vector<2x384xf32> to vector<2x128xf32>
    %175 = vector.extract_strided_slice %173 {offsets = [0, 128], sizes = [2, 128], strides = [1, 1]} : vector<2x384xf32> to vector<2x128xf32>
    %176 = vector.extract_strided_slice %173 {offsets = [0, 256], sizes = [2, 128], strides = [1, 1]} : vector<2x384xf32> to vector<2x128xf32>
    %177 = vector.extract_strided_slice %165 {offsets = [0, 384], sizes = [2, 128], strides = [1, 1]} : vector<2x512xf32> to vector<2x128xf32>
    %178 = math.tanh %177 : vector<2x128xf32>
    %179 = arith.mulf %175, %151 : vector<2x128xf32>
    %180 = arith.mulf %174, %178 : vector<2x128xf32>
    %181 = arith.addf %179, %180 : vector<2x128xf32>
    %182 = math.tanh %181 : vector<2x128xf32>
    %183 = arith.mulf %176, %182 : vector<2x128xf32>
    %c6_i32 = arith.constant 6 : i32
    %184 = arith.truncf %183 : vector<2x128xf32> to vector<2x128xbf16>
    %c0_52 = arith.constant 0 : index
    %c0_53 = arith.constant 0 : index
    %185 = vector.load %arg3[%c0_52, %c0_53] : memref<128x512xbf16, #tpu.memory_space<vmem>>, vector<128x512xbf16>
    %cst_54 = arith.constant dense<0.000000e+00> : vector<2x512xf32>
    %186 = tpu.matmul %184, %185, %cst_54 {dimension_numbers = #tpu.dot_dimension_numbers<[1], [0], [0], [1], [0, 0, 1, 1], [], []>} : vector<2x128xbf16>, vector<128x512xbf16>, vector<2x512xf32> -> vector<2x512xf32>
    %187 = arith.index_cast %c6_i32 : i32 to index
    %c0_55 = arith.constant 0 : index
    %c0_56 = arith.constant 0 : index
    %188 = vector.load %arg0[%187, %c0_55, %c0_56] : memref<8x2x1xf32, #tpu.memory_space<vmem>>, vector<1x2x1xf32>
    %189 = vector.shape_cast %188 : vector<1x2x1xf32> to vector<2x1xf32>
    %190 = vector.broadcast %189 : vector<2x1xf32> to vector<2x512xf32>
    %191 = vector.broadcast %0 : vector<1x512xf32> to vector<2x512xf32>
    %192 = arith.mulf %190, %191 : vector<2x512xf32>
    %193 = arith.addf %186, %192 : vector<2x512xf32>
    %194 = vector.broadcast %1 : vector<1x512xf32> to vector<2x512xf32>
    %195 = arith.addf %193, %194 : vector<2x512xf32>
    %196 = vector.extract_strided_slice %195 {offsets = [0, 0], sizes = [2, 384], strides = [1, 1]} : vector<2x512xf32> to vector<2x384xf32>
    %cst_57 = arith.constant 5.000000e-01 : f32
    %197 = vector.broadcast %cst_57 : f32 to vector<2x384xf32>
    %198 = arith.mulf %197, %196 : vector<2x384xf32>
    %199 = math.tanh %198 : vector<2x384xf32>
    %cst_58 = arith.constant 5.000000e-01 : f32
    %200 = vector.broadcast %cst_58 : f32 to vector<2x384xf32>
    %201 = arith.mulf %200, %199 : vector<2x384xf32>
    %cst_59 = arith.constant 5.000000e-01 : f32
    %202 = vector.broadcast %cst_59 : f32 to vector<2x384xf32>
    %203 = arith.addf %201, %202 : vector<2x384xf32>
    %204 = vector.extract_strided_slice %203 {offsets = [0, 0], sizes = [2, 128], strides = [1, 1]} : vector<2x384xf32> to vector<2x128xf32>
    %205 = vector.extract_strided_slice %203 {offsets = [0, 128], sizes = [2, 128], strides = [1, 1]} : vector<2x384xf32> to vector<2x128xf32>
    %206 = vector.extract_strided_slice %203 {offsets = [0, 256], sizes = [2, 128], strides = [1, 1]} : vector<2x384xf32> to vector<2x128xf32>
    %207 = vector.extract_strided_slice %195 {offsets = [0, 384], sizes = [2, 128], strides = [1, 1]} : vector<2x512xf32> to vector<2x128xf32>
    %208 = math.tanh %207 : vector<2x128xf32>
    %209 = arith.mulf %205, %181 : vector<2x128xf32>
    %210 = arith.mulf %204, %208 : vector<2x128xf32>
    %211 = arith.addf %209, %210 : vector<2x128xf32>
    %212 = math.tanh %211 : vector<2x128xf32>
    %213 = arith.mulf %206, %212 : vector<2x128xf32>
    %c7_i32 = arith.constant 7 : i32
    %214 = arith.truncf %213 : vector<2x128xf32> to vector<2x128xbf16>
    %c0_60 = arith.constant 0 : index
    %c0_61 = arith.constant 0 : index
    %215 = vector.load %arg3[%c0_60, %c0_61] : memref<128x512xbf16, #tpu.memory_space<vmem>>, vector<128x512xbf16>
    %cst_62 = arith.constant dense<0.000000e+00> : vector<2x512xf32>
    %216 = tpu.matmul %214, %215, %cst_62 {dimension_numbers = #tpu.dot_dimension_numbers<[1], [0], [0], [1], [0, 0, 1, 1], [], []>} : vector<2x128xbf16>, vector<128x512xbf16>, vector<2x512xf32> -> vector<2x512xf32>
    %217 = arith.index_cast %c7_i32 : i32 to index
    %c0_63 = arith.constant 0 : index
    %c0_64 = arith.constant 0 : index
    %218 = vector.load %arg0[%217, %c0_63, %c0_64] : memref<8x2x1xf32, #tpu.memory_space<vmem>>, vector<1x2x1xf32>
    %219 = vector.shape_cast %218 : vector<1x2x1xf32> to vector<2x1xf32>
    %220 = vector.broadcast %219 : vector<2x1xf32> to vector<2x512xf32>
    %221 = vector.broadcast %0 : vector<1x512xf32> to vector<2x512xf32>
    %222 = arith.mulf %220, %221 : vector<2x512xf32>
    %223 = arith.addf %216, %222 : vector<2x512xf32>
    %224 = vector.broadcast %1 : vector<1x512xf32> to vector<2x512xf32>
    %225 = arith.addf %223, %224 : vector<2x512xf32>
    %226 = vector.extract_strided_slice %225 {offsets = [0, 0], sizes = [2, 384], strides = [1, 1]} : vector<2x512xf32> to vector<2x384xf32>
    %cst_65 = arith.constant 5.000000e-01 : f32
    %227 = vector.broadcast %cst_65 : f32 to vector<2x384xf32>
    %228 = arith.mulf %227, %226 : vector<2x384xf32>
    %229 = math.tanh %228 : vector<2x384xf32>
    %cst_66 = arith.constant 5.000000e-01 : f32
    %230 = vector.broadcast %cst_66 : f32 to vector<2x384xf32>
    %231 = arith.mulf %230, %229 : vector<2x384xf32>
    %cst_67 = arith.constant 5.000000e-01 : f32
    %232 = vector.broadcast %cst_67 : f32 to vector<2x384xf32>
    %233 = arith.addf %231, %232 : vector<2x384xf32>
    %234 = vector.extract_strided_slice %233 {offsets = [0, 0], sizes = [2, 128], strides = [1, 1]} : vector<2x384xf32> to vector<2x128xf32>
    %235 = vector.extract_strided_slice %233 {offsets = [0, 128], sizes = [2, 128], strides = [1, 1]} : vector<2x384xf32> to vector<2x128xf32>
    %236 = vector.extract_strided_slice %233 {offsets = [0, 256], sizes = [2, 128], strides = [1, 1]} : vector<2x384xf32> to vector<2x128xf32>
    %237 = vector.extract_strided_slice %225 {offsets = [0, 384], sizes = [2, 128], strides = [1, 1]} : vector<2x512xf32> to vector<2x128xf32>
    %238 = math.tanh %237 : vector<2x128xf32>
    %239 = arith.mulf %235, %211 : vector<2x128xf32>
    %240 = arith.mulf %234, %238 : vector<2x128xf32>
    %241 = arith.addf %239, %240 : vector<2x128xf32>
    %242 = math.tanh %241 : vector<2x128xf32>
    %243 = arith.mulf %236, %242 : vector<2x128xf32>
    %c8_i32 = arith.constant 8 : i32
    %244 = arith.truncf %243 : vector<2x128xf32> to vector<2x128xbf16>
    %c0_68 = arith.constant 0 : index
    %c0_69 = arith.constant 0 : index
    %245 = vector.load %arg4[%c0_68, %c0_69] : memref<128x128xbf16, #tpu.memory_space<vmem>>, vector<128x128xbf16>
    %cst_70 = arith.constant dense<0.000000e+00> : vector<2x128xf32>
    %246 = tpu.matmul %244, %245, %cst_70 {dimension_numbers = #tpu.dot_dimension_numbers<[1], [0], [0], [1], [0, 0, 1, 1], [], []>} : vector<2x128xbf16>, vector<128x128xbf16>, vector<2x128xf32> -> vector<2x128xf32>
    %c0_71 = arith.constant 0 : index
    %c0_72 = arith.constant 0 : index
    %247 = vector.load %arg5[%c0_71, %c0_72] : memref<1x128xf32, #tpu.memory_space<vmem>>, vector<1x128xf32>
    %248 = vector.broadcast %247 : vector<1x128xf32> to vector<2x128xf32>
    %249 = arith.addf %246, %248 : vector<2x128xf32>
    %c0_73 = arith.constant 0 : index
    %c0_74 = arith.constant 0 : index
    %250 = vector.load %arg6[%c0_73, %c0_74] : memref<2x128xf32, #tpu.memory_space<vmem>>, vector<2x128xf32>
    tpu.vector_store %arg6[%c0_73, %c0_74], %249 {strides = array<i32>} : memref<2x128xf32, #tpu.memory_space<vmem>>, vector<2x128xf32>,
    return
  }
}

</mosaic_0001>

<bundles_post_ra>
// kernel: lstm_model_forward.1
= control target key start
LH: loop header
LB: loop body
LE: loop exit
PB: predicated region body
PF: predicated region fallthrough
CT: control target
= control target key end

     0   :  { %11 = vsyncpa [#allocation3], 0  ;;  %s1945_s0 = inlined_call_operand.vmem [shape: f32[8,2,1], index: 0, kind: input, shape index: {}]   ;;  %s1946_s1 = inlined_call_operand.vmem [shape: f32[1,512], index: 1, kind: input, shape index: {}]   ;;  %s1947_s2 = inlined_call_operand.vmem [shape: f32[1,512], index: 2, kind: input, shape index: {}]   ;;  %s1948_s3 = inlined_call_operand.hbm [shape: bf16[128,512], index: 3, kind: input, shape index: {}]   ;;  %s1949_s4 = inlined_call_operand.hbm [shape: bf16[128,128], index: 4, kind: input, shape index: {}]   ;;  %s1950_s5 = inlined_call_operand.vmem [shape: f32[1,128], index: 5, kind: input, shape index: {}]   ;;  %s1951_s6 = inlined_call_operand.hbm [shape: f32[2,128], index: 6, kind: output, shape index: {}]  }
   0x1   :  { %12 = vsyncpa [#allocation6], 0 }
   0x2   :  { %13 = vsyncpa [#allocation4], 0  ;;  %s24_s23 = sshll.u32 %s1948_s3, 4  ;;  %s1433_s24 = smov [#allocation2]   ;;  %s25_s23 = int_to_ptr.hbm [resolvable:$true] %s24_s23 }
   0x3   :  { %s26_s25 = sshll.u32 %s1433_s24, 4  ;;  %s37_s28 = sshll.u32 %s1949_s4, 4  ;;  %s27_s25 = int_to_ptr.vmem [resolvable:$true] %s26_s25  ;;  %s38_s28 = int_to_ptr.hbm [resolvable:$true] %s37_s28 }
   0x4   :  { %s1434_s29 = smov 256   ;;  %s1435_s30 = smov 16  }
   0x5   :  { %32 = dma.hbm_to_vmem [thread:$0]  %s25_s23, 4096, %s27_s25, [#allocation3], %s1434_s29, %s1434_s29, %s1435_s30  }
   0x6   :  { %s1436_s7 = smov [#allocation5]   ;;  %s1437_s9 = smov 64  }
   0x7   :  { %s39_s8 = sshll.u32 %s1436_s7, 4  ;;  %s1438_s10 = smov 4   ;;  %s40_s8 = int_to_ptr.vmem [resolvable:$true] %s39_s8 }
   0x8   :  { %45 = dma.hbm_to_vmem [thread:$0]  %s38_s28, 1024, %s40_s8, [#allocation6], %s1437_s9, %s1437_s9, %s1438_s10  }
   0x9   :  { %1427 = dma.done.wait [#allocation3], 4096  }
   0xa   :  { %1428 = vsyncadd [#allocation3], 4294963200 }
   0xb   :  { %1429 = dma.done.wait [#allocation6], 1024  }
   0xc   :  { %1430 = vsyncadd [#allocation6], 4294966272  ;;  %v1439_v0 = vmov 0   ;;  %v1170_v1 = vld [vmem:[#allocation2 + $0xe0] sm:$0xf]  ;;  %s1440_s28 = smov [#allocation7]  }
   0xd   :  { %1271 = vset.pattern.permute.xlu0 %v1439_v0  ;;  %1272 = vset.pattern.permute.xlu1 %v1439_v0  ;;  %v1253_v2 = vld [vmem:[#allocation2 + $0xec] sm:$0xf0]  ;;  %v1251_v3 = vld [vmem:[#allocation2 + $0xe4] sm:$0xf]  ;;  %v1172_v5 = vld [vmem:[#allocation2 + $0xf0] sm:$0xf0] }
   0xe   :  { %1273 = vset.pattern.permute.xlu2 %v1439_v0  ;;  %v1485_v4 = vor.u32 %v1253_v2, %v1170_v1  ;;  %v1178_v6 = vld [vmem:[#allocation2 + $0xe8] sm:$0xf]  ;;  %v1254_v7 = vld [vmem:[#allocation2 + $0xf4] sm:$0xf0]  ;;  %v1487_v8 = vor.u32 %v1251_v3, %v1172_v5  ;;  %v1252_v10 = vld [vmem:[#allocation2 + $0xec] sm:$0xf] }
   0xf   :  { %v1489_v9 = vor.u32 %v1254_v7, %v1178_v6  ;;  %v1180_v11 = vld [vmem:[#allocation2 + $0xf8] sm:$0xf0]  ;;  %v1154_v12 = vld [vmem:[#allocation2 + $0xc0] sm:$0xf]  ;;  %v1249_v14 = vld [vmem:[#allocation2 + $0xcc] sm:$0xf0] }
  0x10   :  { %270 = vmatpush.bf16.msra.mxu0 %v1485_v4  ;;  %v1492_v13 = vor.u32 %v1252_v10, %v1180_v11  ;;  %v1247_v15 = vld [vmem:[#allocation2 + $0xc4] sm:$0xf]  ;;  %v1156_v16 = vld [vmem:[#allocation2 + $0xd0] sm:$0xf0]  ;;  %283 = vmatpush.bf16.msra.mxu1 %v1487_v8  ;;  %v1496_v17 = vor.u32 %v1249_v14, %v1154_v12  ;;  %v1162_v19 = vld [vmem:[#allocation2 + $0xc8] sm:$0xf] }
  0x11   :  { %296 = vmatpush.bf16.msra.mxu2 %v1489_v9  ;;  %v1498_v18 = vor.u32 %v1247_v15, %v1156_v16  ;;  %v1250_v20 = vld [vmem:[#allocation2 + $0xd4] sm:$0xf0]  ;;  %v1248_v21 = vld [vmem:[#allocation2 + $0xcc] sm:$0xf]  ;;  %v1164_v23 = vld [vmem:[#allocation2 + $0xd8] sm:$0xf0] }
  0x12   :  { %309 = vmatpush.bf16.msra.mxu3 %v1492_v13  ;;  %v1501_v22 = vor.u32 %v1250_v20, %v1162_v19  ;;  %v1138_v24 = vld [vmem:[#allocation2 + $0xa0] sm:$0xf]  ;;  %v1245_v25 = vld [vmem:[#allocation2 + $0xac] sm:$0xf0]  ;;  %v1503_v26 = vor.u32 %v1248_v21, %v1164_v23  ;;  %v1243_v27 = vld [vmem:[#allocation2 + $0xa4] sm:$0xf] }
  0x13   :  { %v1140_v28 = vld [vmem:[#allocation2 + $0xb0] sm:$0xf0]  ;;  %v1146_v29 = vld [vmem:[#allocation2 + $0xa8] sm:$0xf]  ;;  %v1506_v30 = vor.u32 %v1245_v25, %v1138_v24  ;;  %v1246_v31 = vld [vmem:[#allocation2 + $0xb4] sm:$0xf0] }
  0x14   :  { %271 = vmatpush.bf16.msra.mxu0 %v1496_v17  ;;  %v1244_v32 = vld [vmem:[#allocation2 + $0xac] sm:$0xf]  ;;  %v1148_v33 = vld [vmem:[#allocation2 + $0xb8] sm:$0xf0]  ;;  %284 = vmatpush.bf16.msra.mxu1 %v1498_v18  ;;  %v1510_v34 = vor.u32 %v1243_v27, %v1140_v28  ;;  %v1512_v35 = vor.u32 %v1246_v31, %v1146_v29  ;;  %v1122_v36 = vld [vmem:[#allocation2 + $0x80] sm:$0xf] }
  0x15   :  { %297 = vmatpush.bf16.msra.mxu2 %v1501_v22  ;;  %v1241_v37 = vld [vmem:[#allocation2 + $0x8c] sm:$0xf0]  ;;  %v1239_v38 = vld [vmem:[#allocation2 + $0x84] sm:$0xf]  ;;  %v1515_v39 = vor.u32 %v1244_v32, %v1148_v33  ;;  %v1124_v40 = vld [vmem:[#allocation2 + $0x90] sm:$0xf0] }
  0x16   :  { %310 = vmatpush.bf16.msra.mxu3 %v1503_v26  ;;  %v1130_v41 = vld [vmem:[#allocation2 + $0x88] sm:$0xf]  ;;  %v1242_v42 = vld [vmem:[#allocation2 + $0x94] sm:$0xf0]  ;;  %v1240_v43 = vld [vmem:[#allocation2 + $0x8c] sm:$0xf]  ;;  %v1518_v45 = vor.u32 %v1241_v37, %v1122_v36  ;;  %v1522_v46 = vor.u32 %v1239_v38, %v1124_v40 }
  0x17   :  { %v1132_v44 = vld [vmem:[#allocation2 + $0x98] sm:$0xf0]  ;;  %v1524_v47 = vor.u32 %v1242_v42, %v1130_v41  ;;  %v1106_v48 = vld [vmem:[#allocation2 + $0x60] sm:$0xf]  ;;  %v1237_v49 = vld [vmem:[#allocation2 + $0x6c] sm:$0xf0] }
  0x18   :  { %272 = vmatpush.bf16.msra.mxu0 %v1506_v30  ;;  %285 = vmatpush.bf16.msra.mxu1 %v1510_v34  ;;  %v1235_v50 = vld [vmem:[#allocation2 + $0x64] sm:$0xf]  ;;  %v1527_v51 = vor.u32 %v1240_v43, %v1132_v44  ;;  %v1108_v52 = vld [vmem:[#allocation2 + $0x70] sm:$0xf0]  ;;  %v1114_v53 = vld [vmem:[#allocation2 + $0x68] sm:$0xf]  ;;  %v1530_v57 = vor.u32 %v1237_v49, %v1106_v48 }
  0x19   :  { %298 = vmatpush.bf16.msra.mxu2 %v1512_v35  ;;  %v1238_v54 = vld [vmem:[#allocation2 + $0x74] sm:$0xf0]  ;;  %v1236_v55 = vld [vmem:[#allocation2 + $0x6c] sm:$0xf]  ;;  %v1116_v56 = vld [vmem:[#allocation2 + $0x78] sm:$0xf0]  ;;  %v1534_v59 = vor.u32 %v1235_v50, %v1108_v52 }
  0x1a   :  { %311 = vmatpush.bf16.msra.mxu3 %v1515_v39  ;;  %v1090_v58 = vld [vmem:[#allocation2 + $0x40] sm:$0xf]  ;;  %v1536_v60 = vor.u32 %v1238_v54, %v1114_v53  ;;  %v1233_v61 = vld [vmem:[#allocation2 + $0x4c] sm:$0xf0]  ;;  %v1231_v62 = vld [vmem:[#allocation2 + $0x44] sm:$0xf]  ;;  %v1542_v1 = vor.u32 %v1236_v55, %v1116_v56 }
  0x1b   :  { %v91_v63 = vld [vmem:[%s1945_s0] sm:$0x3]  ;;  %v1092_v2 = vld [vmem:[#allocation2 + $0x50] sm:$0xf0]  ;;  %v1098_v3 = vld [vmem:[#allocation2 + $0x48] sm:$0xf]  ;;  %v1545_v10 = vor.u32 %v1233_v61, %v1090_v58 }
  0x1c   :  { %273 = vmatpush.bf16.msra.mxu0 %v1518_v45  ;;  %286 = vmatpush.bf16.msra.mxu1 %v1522_v46  ;;  %v1234_v5 = vld [vmem:[#allocation2 + $0x54] sm:$0xf0]  ;;  %v1232_v6 = vld [vmem:[#allocation2 + $0x4c] sm:$0xf]  ;;  %v1100_v7 = vld [vmem:[#allocation2 + $0x58] sm:$0xf0]  ;;  %v1549_v12 = vor.u32 %v1231_v62, %v1092_v2 }
  0x1d   :  { %299 = vmatpush.bf16.msra.mxu2 %v1524_v47  ;;  %94 = vperm.xlu0 %1271, %v91_v63   ;;  %v1074_v11 = vld [vmem:[#allocation2 + $0x20] sm:$0xf]  ;;  %v1551_v14 = vor.u32 %v1234_v5, %v1098_v3  ;;  %v1229_v15 = vld [vmem:[#allocation2 + $0x2c] sm:$0xf0]  ;;  %v1227_v16 = vld [vmem:[#allocation2 + $0x24] sm:$0xf]  ;;  %v1554_v20 = vor.u32 %v1232_v6, %v1100_v7 }
  0x1e   :  { %312 = vmatpush.bf16.msra.mxu3 %v1527_v51  ;;  %v1076_v19 = vld [vmem:[#allocation2 + $0x30] sm:$0xf0]  ;;  %v1082_v21 = vld [vmem:[#allocation2 + $0x28] sm:$0xf]  ;;  %v1230_v23 = vld [vmem:[#allocation2 + $0x34] sm:$0xf0]  ;;  %v1560_v28 = vor.u32 %v1229_v15, %v1074_v11 }
  0x1f   :  { %v1228_v24 = vld [vmem:[#allocation2 + $0x2c] sm:$0xf]  ;;  %v1084_v25 = vld [vmem:[#allocation2 + $0x38] sm:$0xf0]  ;;  %v1184_v27 = vld [vmem:[%s1945_s0 + $0x2] sm:$0x3]  ;;  %v1564_v29 = vor.u32 %v1227_v16, %v1076_v19  ;;  %v1566_v31 = vor.u32 %v1230_v23, %v1082_v21 }
  0x20   :  { %274 = vmatpush.bf16.msra.mxu0 %v1530_v57  ;;  %287 = vmatpush.bf16.msra.mxu1 %v1534_v59  ;;  %v1058_v32 = vld [vmem:[#allocation2] sm:$0xf]  ;;  %v1225_v33 = vld [vmem:[#allocation2 + $0xc] sm:$0xf0]  ;;  %v1223_v36 = vld [vmem:[#allocation2 + $0x4] sm:$0xf]  ;;  %v1569_v37 = vor.u32 %v1228_v24, %v1084_v25 }
  0x21   :  { %300 = vmatpush.bf16.msra.mxu2 %v1536_v60  ;;  %v1060_v38 = vld [vmem:[#allocation2 + $0x10] sm:$0xf0]  ;;  %v1066_v40 = vld [vmem:[#allocation2 + $0x8] sm:$0xf]  ;;  %v1226_v41 = vld [vmem:[#allocation2 + $0x14] sm:$0xf0]  ;;  %v1572_v44 = vor.u32 %v1225_v33, %v1058_v32 }
  0x22   :  { %313 = vmatpush.bf16.msra.mxu3 %v1542_v1  ;;  %v1224_v42 = vld [vmem:[#allocation2 + $0xc] sm:$0xf]  ;;  %v1068_v43 = vld [vmem:[#allocation2 + $0x18] sm:$0xf0]  ;;  %v1576_v48 = vor.u32 %v1223_v36, %v1060_v38  ;;  %v1578_v49 = vor.u32 %v1226_v41, %v1066_v40  ;;  %v58_v56 = vld [vmem:[%s1947_s2] sm:$0xf] }
  0x23   :  { %v1581_v50 = vor.u32 %v1224_v42, %v1068_v43  ;;  %v1189_v52 = vld [vmem:[%s1945_s0 + $0xc] sm:$0x3]  ;;  %v1670_v62 = vperm.slane %v58_v56, 0  ;;  %v1672_v2 = vperm.slane %v58_v56, 1  ;;  %v1681_v24 = vperm.slane %v58_v56, 2  ;;  %s1043_s29 = sshll.u32 %s1440_s28, 4  ;;  %s1044_s29 = int_to_ptr.vmem [resolvable:$true] %s1043_s29 }
  0x24   :  { %275 = vmatpush.bf16.msra.mxu0 %v1545_v10  ;;  %288 = vmatpush.bf16.msra.mxu1 %v1549_v12  ;;  %v1684_v32 = vperm.slane %v58_v56, 3  ;;  %s1045_s8 = sshll.u32 %s1951_s6, 4  ;;  %s1046_s8 = int_to_ptr.hbm [resolvable:$true] %s1045_s8 }
  0x25   :  { %301 = vmatpush.bf16.msra.mxu2 %v1551_v14  ;;  %358 = vperm.xlu0 %1271, %v1184_v27  }
  0x26   :  { %314 = vmatpush.bf16.msra.mxu3 %v1554_v20 }
  0x28   :  { %276 = vmatpush.bf16.msra.mxu0 %v1560_v28  ;;  %289 = vmatpush.bf16.msra.mxu1 %v1564_v29 }
  0x29   :  { %302 = vmatpush.bf16.msra.mxu2 %v1566_v31 }
  0x2a   :  { %315 = vmatpush.bf16.msra.mxu3 %v1569_v37 }
  0x2c   :  { %277 = vmatpush.bf16.msra.mxu0 %v1572_v44  ;;  %290 = vmatpush.bf16.msra.mxu1 %v1576_v48 }
  0x2d   :  { %303 = vmatpush.bf16.msra.mxu2 %v1578_v49  ;;  %788 = vperm.xlu0 %1271, %v1189_v52  }
  0x2e   :  { %316 = vmatpush.bf16.msra.mxu3 %v1581_v50 }
  0x2f   :  { %278 = vmatmul.bf16.vlgmr.msra.gmra.mxu0 %v1439_v0  ;;  %291 = vmatmul.bf16.vlgmr.msra.gmra.mxu1 %v1439_v0 }
  0x30   :  { %378 = vmatpush.bf16.msrb.mxu1 %v1487_v8  ;;  %304 = vmatmul.bf16.vlgmr.msra.gmra.mxu2 %v1439_v0 }
  0x31   :  { %317 = vmatmul.bf16.vlgmr.msra.gmra.mxu3 %v1439_v0  ;;  %365 = vmatpush.bf16.msrb.mxu0 %v1485_v4  ;;  %v57_v0 = vld [vmem:[%s1946_s1] sm:$0xf] }
  0x32   :  { %391 = vmatpush.bf16.msrb.mxu2 %v1489_v9  ;;  %404 = vmatpush.bf16.msrb.mxu3 %v1492_v13  ;;  %v1661_v53 = vperm.slane %v57_v0, 0  ;;  %v1663_v54 = vperm.slane %v57_v0, 1  ;;  %v1674_v7 = vperm.slane %v57_v0, 2  ;;  %v1677_v15 = vperm.slane %v57_v0, 3 }
  0x34   :  { %379 = vmatpush.bf16.msrb.mxu1 %v1498_v18 }
  0x35   :  { %366 = vmatpush.bf16.msrb.mxu0 %v1496_v17 }
  0x36   :  { %392 = vmatpush.bf16.msrb.mxu2 %v1501_v22  ;;  %405 = vmatpush.bf16.msrb.mxu3 %v1503_v26 }
  0x38   :  { %380 = vmatpush.bf16.msrb.mxu1 %v1510_v34 }
  0x39   :  { %367 = vmatpush.bf16.msrb.mxu0 %v1506_v30 }
  0x3a   :  { %393 = vmatpush.bf16.msrb.mxu2 %v1512_v35  ;;  %406 = vmatpush.bf16.msrb.mxu3 %v1515_v39 }
  0x3c   :  { %381 = vmatpush.bf16.msrb.mxu1 %v1522_v46 }
  0x3d   :  { %368 = vmatpush.bf16.msrb.mxu0 %v1518_v45 }
  0x3e   :  { %394 = vmatpush.bf16.msrb.mxu2 %v1524_v47  ;;  %407 = vmatpush.bf16.msrb.mxu3 %v1527_v51 }
  0x40   :  { %382 = vmatpush.bf16.msrb.mxu1 %v1534_v59 }
  0x41   :  { %369 = vmatpush.bf16.msrb.mxu0 %v1530_v57 }
  0x42   :  { %395 = vmatpush.bf16.msrb.mxu2 %v1536_v60  ;;  %408 = vmatpush.bf16.msrb.mxu3 %v1542_v1 }
  0x44   :  { %383 = vmatpush.bf16.msrb.mxu1 %v1549_v12 }
  0x45   :  { %370 = vmatpush.bf16.msrb.mxu0 %v1545_v10 }
  0x46   :  { %396 = vmatpush.bf16.msrb.mxu2 %v1551_v14  ;;  %409 = vmatpush.bf16.msrb.mxu3 %v1554_v20 }
  0x48   :  { %384 = vmatpush.bf16.msrb.mxu1 %v1564_v29 }
  0x49   :  { %371 = vmatpush.bf16.msrb.mxu0 %v1560_v28 }
  0x4a   :  { %397 = vmatpush.bf16.msrb.mxu2 %v1566_v31  ;;  %410 = vmatpush.bf16.msrb.mxu3 %v1569_v37 }
  0x4c   :  { %385 = vmatpush.bf16.msrb.mxu1 %v1576_v48 }
  0x4d   :  { %372 = vmatpush.bf16.msrb.mxu0 %v1572_v44 }
  0x4e   :  { %398 = vmatpush.bf16.msrb.mxu2 %v1578_v49  ;;  %411 = vmatpush.bf16.msrb.mxu3 %v1581_v50 }
  0x50   :  { %464 = vmatpush.bf16.msra.mxu1 %v1487_v8 }
  0x51   :  { %451 = vmatpush.bf16.msra.mxu0 %v1485_v4 }
  0x52   :  { %477 = vmatpush.bf16.msra.mxu2 %v1489_v9  ;;  %490 = vmatpush.bf16.msra.mxu3 %v1492_v13 }
  0x54   :  { %465 = vmatpush.bf16.msra.mxu1 %v1498_v18 }
  0x55   :  { %452 = vmatpush.bf16.msra.mxu0 %v1496_v17 }
  0x56   :  { %478 = vmatpush.bf16.msra.mxu2 %v1501_v22  ;;  %491 = vmatpush.bf16.msra.mxu3 %v1503_v26 }
  0x58   :  { %466 = vmatpush.bf16.msra.mxu1 %v1510_v34 }
  0x59   :  { %453 = vmatpush.bf16.msra.mxu0 %v1506_v30 }
  0x5a   :  { %479 = vmatpush.bf16.msra.mxu2 %v1512_v35  ;;  %492 = vmatpush.bf16.msra.mxu3 %v1515_v39 }
  0x5c   :  { %467 = vmatpush.bf16.msra.mxu1 %v1522_v46 }
  0x5d   :  { %454 = vmatpush.bf16.msra.mxu0 %v1518_v45 }
  0x5e   :  { %480 = vmatpush.bf16.msra.mxu2 %v1524_v47  ;;  %493 = vmatpush.bf16.msra.mxu3 %v1527_v51 }
  0x60   :  { %468 = vmatpush.bf16.msra.mxu1 %v1534_v59 }
  0x61   :  { %455 = vmatpush.bf16.msra.mxu0 %v1530_v57 }
  0x62   :  { %481 = vmatpush.bf16.msra.mxu2 %v1536_v60  ;;  %494 = vmatpush.bf16.msra.mxu3 %v1542_v1 }
  0x64   :  { %469 = vmatpush.bf16.msra.mxu1 %v1549_v12 }
  0x65   :  { %456 = vmatpush.bf16.msra.mxu0 %v1545_v10 }
  0x66   :  { %482 = vmatpush.bf16.msra.mxu2 %v1551_v14  ;;  %495 = vmatpush.bf16.msra.mxu3 %v1554_v20 }
  0x68   :  { %470 = vmatpush.bf16.msra.mxu1 %v1564_v29 }
  0x69   :  { %457 = vmatpush.bf16.msra.mxu0 %v1560_v28 }
  0x6a   :  { %483 = vmatpush.bf16.msra.mxu2 %v1566_v31  ;;  %496 = vmatpush.bf16.msra.mxu3 %v1569_v37 }
  0x6c   :  { %471 = vmatpush.bf16.msra.mxu1 %v1576_v48 }
  0x6d   :  { %458 = vmatpush.bf16.msra.mxu0 %v1572_v44 }
  0x6e   :  { %484 = vmatpush.bf16.msra.mxu2 %v1578_v49  ;;  %497 = vmatpush.bf16.msra.mxu3 %v1581_v50 }
  0x8f   :  { %v95_v55 = vpop.permute.xlu0 %94 }
  0x90   :  { %v106_v58 = vmul.f32 %v1661_v53, %v95_v55  ;;  %v107_v61 = vmul.f32 %v1663_v54, %v95_v55  ;;  %v108_v23 = vmul.f32 %v1674_v7, %v95_v55  ;;  %v109_v27 = vmul.f32 %v1677_v15, %v95_v55 }
  0xac   :  { %v279_v63 = vpop.f32.mrf.mxu0  ;;  %v292_v5 = vpop.f32.mrf.mxu1 }
  0xad   :  { %v280_v3 = vadd.f32 %v279_v63, %v106_v58  ;;  %v293_v6 = vadd.f32 %v292_v5, %v107_v61 }
  0xaf   :  { %v331_v11 = vadd.f32 %v1670_v62, %v280_v3  ;;  %v332_v16 = vadd.f32 %v1672_v2, %v293_v6 }
  0xb1   :  { %v335_v19 = vmul.f32 0.5, %v331_v11  ;;  %v336_v21 = vmul.f32 0.5, %v332_v16 }
  0xb3   :  { %1275 = vtanh.f32 %v335_v19  ;;  %v305_v25 = vpop.f32.mrf.mxu2 }
  0xb4   :  { %1277 = vtanh.f32 %v336_v21  ;;  %v306_v33 = vadd.f32 %v305_v25, %v108_v23  ;;  %v318_v36 = vpop.f32.mrf.mxu3  ;;  %v281_v38 = vpop.f32.mrf.mxu0 }
  0xb5   :  { %v319_v40 = vadd.f32 %v318_v36, %v109_v27  ;;  %v294_v41 = vpop.f32.mrf.mxu1  ;;  %v1185_v38 = vld [vmem:[%s1945_s0 + $0x4] sm:$0x3] }
  0xb6   :  { %v333_v42 = vadd.f32 %v1681_v24, %v306_v33  ;;  %444 = vperm.xlu1 %1272, %v1185_v38  }
  0xb7   :  { %v334_v43 = vadd.f32 %v1684_v32, %v319_v40  ;;  %v359_v40 = vpop.permute.xlu0 %358 }
  0xb8   :  { %v337_v52 = vmul.f32 0.5, %v333_v42  ;;  %v361_v41 = vmul.f32 %v359_v40, %v1661_v53  ;;  %v362_v42 = vmul.f32 %v359_v40, %v1663_v54 }
  0xb9   :  { %v1276_v0 = vpop.eup %1275  ;;  %1279 = vtanh.f32 %v334_v43 }
  0xba   :  { %v1278_v58 = vpop.eup %1277  ;;  %v341_v61 = vmul.f32 0.5, %v1276_v0  ;;  %1281 = vtanh.f32 %v337_v52 }
  0xbb   :  { %v342_v63 = vmul.f32 0.5, %v1278_v58  ;;  %v307_v3 = vpop.f32.mrf.mxu2 }
  0xbc   :  { %v344_v55 = vadd.f32 0.5, %v341_v61  ;;  %v320_v56 = vpop.f32.mrf.mxu3  ;;  %v1186_v3 = vld [vmem:[%s1945_s0 + $0x6] sm:$0x3] }
  0xbd   :  { %v345_v5 = vadd.f32 0.5, %v342_v63 }
  0xbe   :  { %530 = vperm.xlu1 %1272, %v1186_v3  }
  0xbf   :  { %v1280_v6 = vpop.eup %1279  ;;  %v348_v11 = vmul.f32 0.0, %v345_v5  ;;  %v363_v5 = vmul.f32 %v359_v40, %v1674_v7 }
  0xc0   :  { %v349_v16 = vmul.f32 %v1280_v6, %v344_v55  ;;  %v1282_v19 = vpop.eup %1281  ;;  %v364_v6 = vmul.f32 %v359_v40, %v1677_v15 }
  0xc1   :  { %v343_v23 = vmul.f32 0.5, %v1282_v19 }
  0xc2   :  { %v1688_v21 = vadd.f32 %v349_v16, %v348_v11 }
  0xc3   :  { %v346_v25 = vadd.f32 0.5, %v343_v23 }
  0xc4   :  { %1283 = vtanh.f32 %v1688_v21 }
  0xca   :  { %v1284_v27 = vpop.eup %1283 }
  0xcb   :  { %v352_v33 = vmul.f32 %v1284_v27, %v346_v25 }
  0xcd   :  { %v353_v36 = vpack.c.bf16 %v352_v33, %v352_v33  ;;  %v1190_v33 = vld [vmem:[%s1945_s0 + $0xe] sm:$0x3] }
  0xce   :  { %874 = vperm.xlu1 %1272, %v1190_v33  }
  0xcf   :  { %373 = vmatmul.bf16.vlgmr.msrb.gmra.mxu0 %v353_v36  ;;  %386 = vmatmul.bf16.vlgmr.msrb.gmra.mxu1 %v353_v36 }
  0xd0   :  { %399 = vmatmul.bf16.vlgmr.msrb.gmra.mxu2 %v353_v36  ;;  %412 = vmatmul.bf16.vlgmr.msrb.gmra.mxu3 %v353_v36 }
  0xd1   :  { %537 = vmatpush.bf16.msrb.mxu0 %v1485_v4  ;;  %550 = vmatpush.bf16.msrb.mxu1 %v1487_v8 }
  0xd2   :  { %563 = vmatpush.bf16.msrb.mxu2 %v1489_v9  ;;  %576 = vmatpush.bf16.msrb.mxu3 %v1492_v13 }
  0xd5   :  { %538 = vmatpush.bf16.msrb.mxu0 %v1496_v17  ;;  %551 = vmatpush.bf16.msrb.mxu1 %v1498_v18 }
  0xd6   :  { %564 = vmatpush.bf16.msrb.mxu2 %v1501_v22  ;;  %577 = vmatpush.bf16.msrb.mxu3 %v1503_v26 }
  0xd9   :  { %539 = vmatpush.bf16.msrb.mxu0 %v1506_v30  ;;  %552 = vmatpush.bf16.msrb.mxu1 %v1510_v34 }
  0xda   :  { %565 = vmatpush.bf16.msrb.mxu2 %v1512_v35  ;;  %578 = vmatpush.bf16.msrb.mxu3 %v1515_v39 }
  0xdd   :  { %540 = vmatpush.bf16.msrb.mxu0 %v1518_v45  ;;  %553 = vmatpush.bf16.msrb.mxu1 %v1522_v46 }
  0xde   :  { %566 = vmatpush.bf16.msrb.mxu2 %v1524_v47  ;;  %579 = vmatpush.bf16.msrb.mxu3 %v1527_v51 }
  0xe1   :  { %541 = vmatpush.bf16.msrb.mxu0 %v1530_v57  ;;  %554 = vmatpush.bf16.msrb.mxu1 %v1534_v59 }
  0xe2   :  { %567 = vmatpush.bf16.msrb.mxu2 %v1536_v60  ;;  %580 = vmatpush.bf16.msrb.mxu3 %v1542_v1 }
  0xe5   :  { %542 = vmatpush.bf16.msrb.mxu0 %v1545_v10  ;;  %555 = vmatpush.bf16.msrb.mxu1 %v1549_v12 }
  0xe6   :  { %568 = vmatpush.bf16.msrb.mxu2 %v1551_v14  ;;  %581 = vmatpush.bf16.msrb.mxu3 %v1554_v20 }
  0xe9   :  { %543 = vmatpush.bf16.msrb.mxu0 %v1560_v28  ;;  %556 = vmatpush.bf16.msrb.mxu1 %v1564_v29 }
  0xea   :  { %569 = vmatpush.bf16.msrb.mxu2 %v1566_v31  ;;  %582 = vmatpush.bf16.msrb.mxu3 %v1569_v37 }
  0xed   :  { %544 = vmatpush.bf16.msrb.mxu0 %v1572_v44  ;;  %557 = vmatpush.bf16.msrb.mxu1 %v1576_v48 }
  0xee   :  { %570 = vmatpush.bf16.msrb.mxu2 %v1578_v49  ;;  %583 = vmatpush.bf16.msrb.mxu3 %v1581_v50 }
 0x14c   :  { %v374_v43 = vpop.f32.mrf.mxu0  ;;  %v387_v52 = vpop.f32.mrf.mxu1 }
 0x14d   :  { %v375_v0 = vadd.f32 %v374_v43, %v361_v41  ;;  %v388_v58 = vadd.f32 %v387_v52, %v362_v42 }
 0x14f   :  { %v417_v61 = vadd.f32 %v375_v0, %v1670_v62  ;;  %v418_v63 = vadd.f32 %v388_v58, %v1672_v2 }
 0x151   :  { %v421_v55 = vmul.f32 0.5, %v417_v61  ;;  %v422_v56 = vmul.f32 0.5, %v418_v63 }
 0x153   :  { %1285 = vtanh.f32 %v421_v55  ;;  %v400_v11 = vpop.f32.mrf.mxu2  ;;  %v413_v16 = vpop.f32.mrf.mxu3 }
 0x154   :  { %1287 = vtanh.f32 %v422_v56  ;;  %v401_v19 = vadd.f32 %v400_v11, %v363_v5  ;;  %v414_v23 = vadd.f32 %v413_v16, %v364_v6  ;;  %v376_v25 = vpop.f32.mrf.mxu0  ;;  %v389_v27 = vpop.f32.mrf.mxu1 }
 0x156   :  { %v419_v36 = vadd.f32 %v401_v19, %v1681_v24  ;;  %v420_v38 = vadd.f32 %v414_v23, %v1684_v32 }
 0x158   :  { %v423_v41 = vmul.f32 0.5, %v419_v36  ;;  %1289 = vtanh.f32 %v420_v38 }
 0x159   :  { %v1286_v40 = vpop.eup %1285 }
 0x15a   :  { %v1288_v42 = vpop.eup %1287  ;;  %v427_v43 = vmul.f32 0.5, %v1286_v40  ;;  %1291 = vtanh.f32 %v423_v41 }
 0x15b   :  { %v428_v52 = vmul.f32 0.5, %v1288_v42  ;;  %v402_v0 = vpop.f32.mrf.mxu2  ;;  %v415_v58 = vpop.f32.mrf.mxu3 }
 0x15c   :  { %v430_v61 = vadd.f32 0.5, %v427_v43 }
 0x15d   :  { %v431_v63 = vadd.f32 0.5, %v428_v52 }
 0x15e   :  { %v1290_v3 = vpop.eup %1289 }
 0x15f   :  { %v434_v55 = vmul.f32 %v431_v63, %v1688_v21  ;;  %v435_v56 = vmul.f32 %v1290_v3, %v430_v61  ;;  %v445_v21 = vpop.permute.xlu1 %444 }
 0x160   :  { %v1292_v5 = vpop.eup %1291  ;;  %v447_v27 = vmul.f32 %v445_v21, %v1661_v53  ;;  %v448_v33 = vmul.f32 %v445_v21, %v1663_v54  ;;  %v449_v58 = vmul.f32 %v445_v21, %v1674_v7  ;;  %v450_v61 = vmul.f32 %v445_v21, %v1677_v15 }
 0x161   :  { %v1741_v6 = vadd.f32 %v435_v56, %v434_v55  ;;  %v429_v11 = vmul.f32 0.5, %v1292_v5 }
 0x163   :  { %1293 = vtanh.f32 %v1741_v6  ;;  %v432_v16 = vadd.f32 0.5, %v429_v11 }
 0x169   :  { %v1294_v19 = vpop.eup %1293 }
 0x16a   :  { %v438_v23 = vmul.f32 %v1294_v19, %v432_v16 }
 0x16c   :  { %v439_v25 = vpack.c.bf16 %v438_v23, %v438_v23 }
 0x16e   :  { %459 = vmatmul.bf16.vlgmr.msra.gmra.mxu0 %v439_v25  ;;  %472 = vmatmul.bf16.vlgmr.msra.gmra.mxu1 %v439_v25 }
 0x16f   :  { %485 = vmatmul.bf16.vlgmr.msra.gmra.mxu2 %v439_v25  ;;  %498 = vmatmul.bf16.vlgmr.msra.gmra.mxu3 %v439_v25 }
 0x170   :  { %623 = vmatpush.bf16.msra.mxu0 %v1485_v4  ;;  %636 = vmatpush.bf16.msra.mxu1 %v1487_v8 }
 0x171   :  { %649 = vmatpush.bf16.msra.mxu2 %v1489_v9  ;;  %662 = vmatpush.bf16.msra.mxu3 %v1492_v13 }
 0x174   :  { %624 = vmatpush.bf16.msra.mxu0 %v1496_v17  ;;  %637 = vmatpush.bf16.msra.mxu1 %v1498_v18 }
 0x175   :  { %650 = vmatpush.bf16.msra.mxu2 %v1501_v22  ;;  %663 = vmatpush.bf16.msra.mxu3 %v1503_v26 }
 0x178   :  { %625 = vmatpush.bf16.msra.mxu0 %v1506_v30  ;;  %638 = vmatpush.bf16.msra.mxu1 %v1510_v34 }
 0x179   :  { %651 = vmatpush.bf16.msra.mxu2 %v1512_v35  ;;  %664 = vmatpush.bf16.msra.mxu3 %v1515_v39 }
 0x17c   :  { %626 = vmatpush.bf16.msra.mxu0 %v1518_v45  ;;  %639 = vmatpush.bf16.msra.mxu1 %v1522_v46 }
 0x17d   :  { %652 = vmatpush.bf16.msra.mxu2 %v1524_v47  ;;  %665 = vmatpush.bf16.msra.mxu3 %v1527_v51 }
 0x180   :  { %627 = vmatpush.bf16.msra.mxu0 %v1530_v57  ;;  %640 = vmatpush.bf16.msra.mxu1 %v1534_v59 }
 0x181   :  { %653 = vmatpush.bf16.msra.mxu2 %v1536_v60  ;;  %666 = vmatpush.bf16.msra.mxu3 %v1542_v1 }
 0x184   :  { %628 = vmatpush.bf16.msra.mxu0 %v1545_v10  ;;  %641 = vmatpush.bf16.msra.mxu1 %v1549_v12 }
 0x185   :  { %654 = vmatpush.bf16.msra.mxu2 %v1551_v14  ;;  %667 = vmatpush.bf16.msra.mxu3 %v1554_v20 }
 0x188   :  { %629 = vmatpush.bf16.msra.mxu0 %v1560_v28  ;;  %642 = vmatpush.bf16.msra.mxu1 %v1564_v29 }
 0x189   :  { %655 = vmatpush.bf16.msra.mxu2 %v1566_v31  ;;  %668 = vmatpush.bf16.msra.mxu3 %v1569_v37 }
 0x18c   :  { %630 = vmatpush.bf16.msra.mxu0 %v1572_v44  ;;  %643 = vmatpush.bf16.msra.mxu1 %v1576_v48 }
 0x18d   :  { %656 = vmatpush.bf16.msra.mxu2 %v1578_v49  ;;  %669 = vmatpush.bf16.msra.mxu3 %v1581_v50 }
 0x1eb   :  { %v460_v36 = vpop.f32.mrf.mxu0  ;;  %v473_v38 = vpop.f32.mrf.mxu1 }
 0x1ec   :  { %v461_v41 = vadd.f32 %v460_v36, %v447_v27  ;;  %v474_v40 = vadd.f32 %v473_v38, %v448_v33 }
 0x1ee   :  { %v503_v42 = vadd.f32 %v461_v41, %v1670_v62  ;;  %v504_v43 = vadd.f32 %v474_v40, %v1672_v2 }
 0x1f0   :  { %v507_v52 = vmul.f32 0.5, %v503_v42  ;;  %v508_v0 = vmul.f32 0.5, %v504_v43 }
 0x1f2   :  { %1295 = vtanh.f32 %v507_v52  ;;  %v486_v63 = vpop.f32.mrf.mxu2  ;;  %v499_v3 = vpop.f32.mrf.mxu3 }
 0x1f3   :  { %1297 = vtanh.f32 %v508_v0  ;;  %v487_v55 = vadd.f32 %v486_v63, %v449_v58  ;;  %v500_v56 = vadd.f32 %v499_v3, %v450_v61  ;;  %v462_v5 = vpop.f32.mrf.mxu0  ;;  %v475_v11 = vpop.f32.mrf.mxu1 }
 0x1f5   :  { %v505_v16 = vadd.f32 %v487_v55, %v1681_v24  ;;  %v506_v19 = vadd.f32 %v500_v56, %v1684_v32 }
 0x1f7   :  { %v509_v23 = vmul.f32 0.5, %v505_v16  ;;  %1299 = vtanh.f32 %v506_v19 }
 0x1f8   :  { %v1296_v25 = vpop.eup %1295 }
 0x1f9   :  { %v1298_v27 = vpop.eup %1297  ;;  %v513_v33 = vmul.f32 0.5, %v1296_v25  ;;  %1301 = vtanh.f32 %v509_v23 }
 0x1fa   :  { %v514_v36 = vmul.f32 0.5, %v1298_v27  ;;  %v488_v21 = vpop.f32.mrf.mxu2  ;;  %v501_v38 = vpop.f32.mrf.mxu3 }
 0x1fb   :  { %v516_v41 = vadd.f32 0.5, %v513_v33 }
 0x1fc   :  { %v517_v40 = vadd.f32 0.5, %v514_v36  ;;  %v1187_v36 = vld [vmem:[%s1945_s0 + $0x8] sm:$0x3] }
 0x1fd   :  { %v1300_v42 = vpop.eup %1299  ;;  %616 = vperm.xlu2 %1273, %v1187_v36  }
 0x1fe   :  { %v520_v43 = vmul.f32 %v517_v40, %v1741_v6  ;;  %v521_v52 = vmul.f32 %v1300_v42, %v516_v41  ;;  %v531_v6 = vpop.permute.xlu1 %530 }
 0x1ff   :  { %v1302_v0 = vpop.eup %1301  ;;  %v533_v5 = vmul.f32 %v531_v6, %v1661_v53  ;;  %v534_v11 = vmul.f32 %v531_v6, %v1663_v54  ;;  %v535_v41 = vmul.f32 %v531_v6, %v1674_v7  ;;  %v536_v40 = vmul.f32 %v531_v6, %v1677_v15 }
 0x200   :  { %v1785_v58 = vadd.f32 %v521_v52, %v520_v43  ;;  %v515_v61 = vmul.f32 0.5, %v1302_v0 }
 0x202   :  { %1303 = vtanh.f32 %v1785_v58  ;;  %v518_v63 = vadd.f32 0.5, %v515_v61 }
 0x208   :  { %v1304_v3 = vpop.eup %1303 }
 0x209   :  { %v524_v55 = vmul.f32 %v1304_v3, %v518_v63  ;;  %v1188_v3 = vld [vmem:[%s1945_s0 + $0xa] sm:$0x3] }
 0x20a   :  { %702 = vperm.xlu2 %1273, %v1188_v3  }
 0x20b   :  { %v525_v56 = vpack.c.bf16 %v524_v55, %v524_v55 }
 0x20d   :  { %545 = vmatmul.bf16.vlgmr.msrb.gmra.mxu0 %v525_v56  ;;  %558 = vmatmul.bf16.vlgmr.msrb.gmra.mxu1 %v525_v56 }
 0x20e   :  { %571 = vmatmul.bf16.vlgmr.msrb.gmra.mxu2 %v525_v56  ;;  %584 = vmatmul.bf16.vlgmr.msrb.gmra.mxu3 %v525_v56 }
 0x20f   :  { %709 = vmatpush.bf16.msrb.mxu0 %v1485_v4  ;;  %722 = vmatpush.bf16.msrb.mxu1 %v1487_v8 }
 0x210   :  { %735 = vmatpush.bf16.msrb.mxu2 %v1489_v9  ;;  %748 = vmatpush.bf16.msrb.mxu3 %v1492_v13 }
 0x213   :  { %710 = vmatpush.bf16.msrb.mxu0 %v1496_v17  ;;  %723 = vmatpush.bf16.msrb.mxu1 %v1498_v18 }
 0x214   :  { %736 = vmatpush.bf16.msrb.mxu2 %v1501_v22  ;;  %749 = vmatpush.bf16.msrb.mxu3 %v1503_v26 }
 0x217   :  { %711 = vmatpush.bf16.msrb.mxu0 %v1506_v30  ;;  %724 = vmatpush.bf16.msrb.mxu1 %v1510_v34 }
 0x218   :  { %737 = vmatpush.bf16.msrb.mxu2 %v1512_v35  ;;  %750 = vmatpush.bf16.msrb.mxu3 %v1515_v39 }
 0x21b   :  { %712 = vmatpush.bf16.msrb.mxu0 %v1518_v45  ;;  %725 = vmatpush.bf16.msrb.mxu1 %v1522_v46 }
 0x21c   :  { %738 = vmatpush.bf16.msrb.mxu2 %v1524_v47  ;;  %751 = vmatpush.bf16.msrb.mxu3 %v1527_v51 }
 0x21f   :  { %713 = vmatpush.bf16.msrb.mxu0 %v1530_v57  ;;  %726 = vmatpush.bf16.msrb.mxu1 %v1534_v59 }
 0x220   :  { %739 = vmatpush.bf16.msrb.mxu2 %v1536_v60  ;;  %752 = vmatpush.bf16.msrb.mxu3 %v1542_v1 }
 0x223   :  { %714 = vmatpush.bf16.msrb.mxu0 %v1545_v10  ;;  %727 = vmatpush.bf16.msrb.mxu1 %v1549_v12 }
 0x224   :  { %740 = vmatpush.bf16.msrb.mxu2 %v1551_v14  ;;  %753 = vmatpush.bf16.msrb.mxu3 %v1554_v20 }
 0x227   :  { %715 = vmatpush.bf16.msrb.mxu0 %v1560_v28  ;;  %728 = vmatpush.bf16.msrb.mxu1 %v1564_v29 }
 0x228   :  { %741 = vmatpush.bf16.msrb.mxu2 %v1566_v31  ;;  %754 = vmatpush.bf16.msrb.mxu3 %v1569_v37 }
 0x22b   :  { %716 = vmatpush.bf16.msrb.mxu0 %v1572_v44  ;;  %729 = vmatpush.bf16.msrb.mxu1 %v1576_v48 }
 0x22c   :  { %742 = vmatpush.bf16.msrb.mxu2 %v1578_v49  ;;  %755 = vmatpush.bf16.msrb.mxu3 %v1581_v50 }
 0x28a   :  { %v546_v16 = vpop.f32.mrf.mxu0  ;;  %v559_v19 = vpop.f32.mrf.mxu1 }
 0x28b   :  { %v547_v23 = vadd.f32 %v546_v16, %v533_v5  ;;  %v560_v25 = vadd.f32 %v559_v19, %v534_v11 }
 0x28d   :  { %v589_v27 = vadd.f32 %v547_v23, %v1670_v62  ;;  %v590_v33 = vadd.f32 %v560_v25, %v1672_v2 }
 0x28f   :  { %v593_v21 = vmul.f32 0.5, %v589_v27  ;;  %v594_v38 = vmul.f32 0.5, %v590_v33 }
 0x291   :  { %1305 = vtanh.f32 %v593_v21  ;;  %v572_v42 = vpop.f32.mrf.mxu2  ;;  %v585_v43 = vpop.f32.mrf.mxu3 }
 0x292   :  { %1307 = vtanh.f32 %v594_v38  ;;  %v573_v52 = vadd.f32 %v572_v42, %v535_v41  ;;  %v586_v0 = vadd.f32 %v585_v43, %v536_v40  ;;  %v548_v61 = vpop.f32.mrf.mxu0  ;;  %v561_v63 = vpop.f32.mrf.mxu1 }
 0x294   :  { %v591_v55 = vadd.f32 %v573_v52, %v1681_v24  ;;  %v592_v56 = vadd.f32 %v586_v0, %v1684_v32 }
 0x296   :  { %v595_v5 = vmul.f32 0.5, %v591_v55  ;;  %1309 = vtanh.f32 %v592_v56 }
 0x297   :  { %v1306_v6 = vpop.eup %1305 }
 0x298   :  { %v1308_v11 = vpop.eup %1307  ;;  %v599_v16 = vmul.f32 0.5, %v1306_v6  ;;  %1311 = vtanh.f32 %v595_v5 }
 0x299   :  { %v600_v19 = vmul.f32 0.5, %v1308_v11  ;;  %v574_v23 = vpop.f32.mrf.mxu2  ;;  %v587_v25 = vpop.f32.mrf.mxu3 }
 0x29a   :  { %v602_v27 = vadd.f32 0.5, %v599_v16 }
 0x29b   :  { %v603_v33 = vadd.f32 0.5, %v600_v19 }
 0x29c   :  { %v1310_v36 = vpop.eup %1309 }
 0x29d   :  { %v606_v21 = vmul.f32 %v603_v33, %v1785_v58  ;;  %v607_v38 = vmul.f32 %v1310_v36, %v602_v27  ;;  %v617_v58 = vpop.permute.xlu2 %616 }
 0x29e   :  { %v1312_v41 = vpop.eup %1311  ;;  %v619_v63 = vmul.f32 %v617_v58, %v1661_v53  ;;  %v620_v3 = vmul.f32 %v617_v58, %v1663_v54  ;;  %v621_v25 = vmul.f32 %v617_v58, %v1674_v7  ;;  %v622_v27 = vmul.f32 %v617_v58, %v1677_v15 }
 0x29f   :  { %v1835_v40 = vadd.f32 %v607_v38, %v606_v21  ;;  %v601_v42 = vmul.f32 0.5, %v1312_v41 }
 0x2a1   :  { %1313 = vtanh.f32 %v1835_v40  ;;  %v604_v43 = vadd.f32 0.5, %v601_v42 }
 0x2a7   :  { %v1314_v52 = vpop.eup %1313 }
 0x2a8   :  { %v610_v0 = vmul.f32 %v1314_v52, %v604_v43 }
 0x2aa   :  { %v611_v61 = vpack.c.bf16 %v610_v0, %v610_v0 }
 0x2ac   :  { %631 = vmatmul.bf16.vlgmr.msra.gmra.mxu0 %v611_v61  ;;  %644 = vmatmul.bf16.vlgmr.msra.gmra.mxu1 %v611_v61 }
 0x2ad   :  { %657 = vmatmul.bf16.vlgmr.msra.gmra.mxu2 %v611_v61  ;;  %670 = vmatmul.bf16.vlgmr.msra.gmra.mxu3 %v611_v61 }
 0x2ae   :  { %795 = vmatpush.bf16.msra.mxu0 %v1485_v4  ;;  %808 = vmatpush.bf16.msra.mxu1 %v1487_v8 }
 0x2af   :  { %821 = vmatpush.bf16.msra.mxu2 %v1489_v9  ;;  %834 = vmatpush.bf16.msra.mxu3 %v1492_v13 }
 0x2b2   :  { %796 = vmatpush.bf16.msra.mxu0 %v1496_v17  ;;  %809 = vmatpush.bf16.msra.mxu1 %v1498_v18 }
 0x2b3   :  { %822 = vmatpush.bf16.msra.mxu2 %v1501_v22  ;;  %835 = vmatpush.bf16.msra.mxu3 %v1503_v26 }
 0x2b6   :  { %797 = vmatpush.bf16.msra.mxu0 %v1506_v30  ;;  %810 = vmatpush.bf16.msra.mxu1 %v1510_v34 }
 0x2b7   :  { %823 = vmatpush.bf16.msra.mxu2 %v1512_v35  ;;  %836 = vmatpush.bf16.msra.mxu3 %v1515_v39 }
 0x2ba   :  { %798 = vmatpush.bf16.msra.mxu0 %v1518_v45  ;;  %811 = vmatpush.bf16.msra.mxu1 %v1522_v46 }
 0x2bb   :  { %824 = vmatpush.bf16.msra.mxu2 %v1524_v47  ;;  %837 = vmatpush.bf16.msra.mxu3 %v1527_v51 }
 0x2be   :  { %799 = vmatpush.bf16.msra.mxu0 %v1530_v57  ;;  %812 = vmatpush.bf16.msra.mxu1 %v1534_v59 }
 0x2bf   :  { %825 = vmatpush.bf16.msra.mxu2 %v1536_v60  ;;  %838 = vmatpush.bf16.msra.mxu3 %v1542_v1 }
 0x2c2   :  { %800 = vmatpush.bf16.msra.mxu0 %v1545_v10  ;;  %813 = vmatpush.bf16.msra.mxu1 %v1549_v12 }
 0x2c3   :  { %826 = vmatpush.bf16.msra.mxu2 %v1551_v14  ;;  %839 = vmatpush.bf16.msra.mxu3 %v1554_v20 }
 0x2c6   :  { %801 = vmatpush.bf16.msra.mxu0 %v1560_v28  ;;  %814 = vmatpush.bf16.msra.mxu1 %v1564_v29 }
 0x2c7   :  { %827 = vmatpush.bf16.msra.mxu2 %v1566_v31  ;;  %840 = vmatpush.bf16.msra.mxu3 %v1569_v37 }
 0x2ca   :  { %802 = vmatpush.bf16.msra.mxu0 %v1572_v44  ;;  %815 = vmatpush.bf16.msra.mxu1 %v1576_v48 }
 0x2cb   :  { %828 = vmatpush.bf16.msra.mxu2 %v1578_v49  ;;  %841 = vmatpush.bf16.msra.mxu3 %v1581_v50 }
 0x329   :  { %v632_v55 = vpop.f32.mrf.mxu0  ;;  %v645_v56 = vpop.f32.mrf.mxu1 }
 0x32a   :  { %v633_v5 = vadd.f32 %v632_v55, %v619_v63  ;;  %v646_v6 = vadd.f32 %v645_v56, %v620_v3 }
 0x32c   :  { %v675_v11 = vadd.f32 %v633_v5, %v1670_v62  ;;  %v676_v16 = vadd.f32 %v646_v6, %v1672_v2 }
 0x32e   :  { %v679_v19 = vmul.f32 0.5, %v675_v11  ;;  %v680_v23 = vmul.f32 0.5, %v676_v16 }
 0x330   :  { %1315 = vtanh.f32 %v679_v19  ;;  %v658_v33 = vpop.f32.mrf.mxu2  ;;  %v671_v36 = vpop.f32.mrf.mxu3 }
 0x331   :  { %1317 = vtanh.f32 %v680_v23  ;;  %v659_v21 = vadd.f32 %v658_v33, %v621_v25  ;;  %v672_v38 = vadd.f32 %v671_v36, %v622_v27  ;;  %v634_v41 = vpop.f32.mrf.mxu0  ;;  %v647_v42 = vpop.f32.mrf.mxu1 }
 0x333   :  { %v677_v43 = vadd.f32 %v659_v21, %v1681_v24  ;;  %v678_v52 = vadd.f32 %v672_v38, %v1684_v32 }
 0x335   :  { %v681_v0 = vmul.f32 0.5, %v677_v43  ;;  %1319 = vtanh.f32 %v678_v52 }
 0x336   :  { %v1316_v61 = vpop.eup %1315 }
 0x337   :  { %v1318_v63 = vpop.eup %1317  ;;  %v685_v3 = vmul.f32 0.5, %v1316_v61  ;;  %1321 = vtanh.f32 %v681_v0 }
 0x338   :  { %v686_v55 = vmul.f32 0.5, %v1318_v63  ;;  %v660_v58 = vpop.f32.mrf.mxu2  ;;  %v673_v56 = vpop.f32.mrf.mxu3 }
 0x339   :  { %v688_v5 = vadd.f32 0.5, %v685_v3  ;;  %v789_v3 = vpop.permute.xlu0 %788 }
 0x33a   :  { %v689_v6 = vadd.f32 0.5, %v686_v55  ;;  %v791_v55 = vmul.f32 %v789_v3, %v1661_v53  ;;  %v792_v58 = vmul.f32 %v789_v3, %v1663_v54 }
 0x33b   :  { %v1320_v11 = vpop.eup %1319 }
 0x33c   :  { %v692_v16 = vmul.f32 %v689_v6, %v1835_v40  ;;  %v693_v19 = vmul.f32 %v1320_v11, %v688_v5 }
 0x33d   :  { %v1322_v23 = vpop.eup %1321 }
 0x33e   :  { %v1879_v25 = vadd.f32 %v693_v19, %v692_v16  ;;  %v687_v27 = vmul.f32 0.5, %v1322_v23 }
 0x340   :  { %1323 = vtanh.f32 %v1879_v25  ;;  %v690_v33 = vadd.f32 0.5, %v687_v27  ;;  %v793_v27 = vmul.f32 %v789_v3, %v1674_v7 }
 0x346   :  { %v1324_v36 = vpop.eup %1323 }
 0x347   :  { %v696_v21 = vmul.f32 %v1324_v36, %v690_v33  ;;  %v794_v33 = vmul.f32 %v789_v3, %v1677_v15 }
 0x349   :  { %v697_v38 = vpack.c.bf16 %v696_v21, %v696_v21 }
 0x34b   :  { %717 = vmatmul.bf16.vlgmr.msrb.gmra.mxu0 %v697_v38  ;;  %730 = vmatmul.bf16.vlgmr.msrb.gmra.mxu1 %v697_v38 }
 0x34c   :  { %743 = vmatmul.bf16.vlgmr.msrb.gmra.mxu2 %v697_v38  ;;  %756 = vmatmul.bf16.vlgmr.msrb.gmra.mxu3 %v697_v38 }
 0x34d   :  { %881 = vmatpush.bf16.msrb.mxu0 %v1485_v4  ;;  %894 = vmatpush.bf16.msrb.mxu1 %v1487_v8  ;;  %v703_v4 = vpop.permute.xlu2 %702 }
 0x34e   :  { %907 = vmatpush.bf16.msrb.mxu2 %v1489_v9  ;;  %920 = vmatpush.bf16.msrb.mxu3 %v1492_v13  ;;  %v705_v8 = vmul.f32 %v703_v4, %v1661_v53  ;;  %v706_v9 = vmul.f32 %v703_v4, %v1663_v54 }
 0x351   :  { %882 = vmatpush.bf16.msrb.mxu0 %v1496_v17  ;;  %895 = vmatpush.bf16.msrb.mxu1 %v1498_v18 }
 0x352   :  { %908 = vmatpush.bf16.msrb.mxu2 %v1501_v22  ;;  %921 = vmatpush.bf16.msrb.mxu3 %v1503_v26 }
 0x355   :  { %883 = vmatpush.bf16.msrb.mxu0 %v1506_v30  ;;  %896 = vmatpush.bf16.msrb.mxu1 %v1510_v34 }
 0x356   :  { %909 = vmatpush.bf16.msrb.mxu2 %v1512_v35  ;;  %922 = vmatpush.bf16.msrb.mxu3 %v1515_v39  ;;  %v707_v39 = vmul.f32 %v703_v4, %v1674_v7 }
 0x359   :  { %884 = vmatpush.bf16.msrb.mxu0 %v1518_v45  ;;  %897 = vmatpush.bf16.msrb.mxu1 %v1522_v46  ;;  %v708_v45 = vmul.f32 %v703_v4, %v1677_v15 }
 0x35a   :  { %910 = vmatpush.bf16.msrb.mxu2 %v1524_v47  ;;  %923 = vmatpush.bf16.msrb.mxu3 %v1527_v51 }
 0x35d   :  { %885 = vmatpush.bf16.msrb.mxu0 %v1530_v57  ;;  %898 = vmatpush.bf16.msrb.mxu1 %v1534_v59 }
 0x35e   :  { %911 = vmatpush.bf16.msrb.mxu2 %v1536_v60  ;;  %924 = vmatpush.bf16.msrb.mxu3 %v1542_v1 }
 0x361   :  { %886 = vmatpush.bf16.msrb.mxu0 %v1545_v10  ;;  %899 = vmatpush.bf16.msrb.mxu1 %v1549_v12 }
 0x362   :  { %912 = vmatpush.bf16.msrb.mxu2 %v1551_v14  ;;  %925 = vmatpush.bf16.msrb.mxu3 %v1554_v20 }
 0x365   :  { %887 = vmatpush.bf16.msrb.mxu0 %v1560_v28  ;;  %900 = vmatpush.bf16.msrb.mxu1 %v1564_v29 }
 0x366   :  { %913 = vmatpush.bf16.msrb.mxu2 %v1566_v31  ;;  %926 = vmatpush.bf16.msrb.mxu3 %v1569_v37 }
 0x369   :  { %888 = vmatpush.bf16.msrb.mxu0 %v1572_v44  ;;  %901 = vmatpush.bf16.msrb.mxu1 %v1576_v48 }
 0x36a   :  { %914 = vmatpush.bf16.msrb.mxu2 %v1578_v49  ;;  %927 = vmatpush.bf16.msrb.mxu3 %v1581_v50 }
 0x3c8   :  { %v718_v13 = vpop.f32.mrf.mxu0  ;;  %v731_v17 = vpop.f32.mrf.mxu1 }
 0x3c9   :  { %v719_v18 = vadd.f32 %v718_v13, %v705_v8  ;;  %v732_v22 = vadd.f32 %v731_v17, %v706_v9 }
 0x3cb   :  { %v761_v26 = vadd.f32 %v719_v18, %v1670_v62  ;;  %v762_v30 = vadd.f32 %v732_v22, %v1672_v2 }
 0x3cd   :  { %v765_v34 = vmul.f32 0.5, %v761_v26  ;;  %v766_v35 = vmul.f32 0.5, %v762_v30 }
 0x3cf   :  { %1325 = vtanh.f32 %v765_v34  ;;  %v744_v46 = vpop.f32.mrf.mxu2  ;;  %v757_v47 = vpop.f32.mrf.mxu3 }
 0x3d0   :  { %1327 = vtanh.f32 %v766_v35  ;;  %v745_v51 = vadd.f32 %v744_v46, %v707_v39  ;;  %v758_v57 = vadd.f32 %v757_v47, %v708_v45  ;;  %v720_v59 = vpop.f32.mrf.mxu0  ;;  %v733_v60 = vpop.f32.mrf.mxu1 }
 0x3d2   :  { %v763_v1 = vadd.f32 %v745_v51, %v1681_v24  ;;  %v764_v10 = vadd.f32 %v758_v57, %v1684_v32 }
 0x3d4   :  { %v767_v12 = vmul.f32 0.5, %v763_v1  ;;  %1329 = vtanh.f32 %v764_v10 }
 0x3d5   :  { %v1326_v14 = vpop.eup %1325 }
 0x3d6   :  { %v1328_v20 = vpop.eup %1327  ;;  %v771_v28 = vmul.f32 0.5, %v1326_v14  ;;  %1331 = vtanh.f32 %v767_v12 }
 0x3d7   :  { %v772_v29 = vmul.f32 0.5, %v1328_v20  ;;  %v746_v31 = vpop.f32.mrf.mxu2  ;;  %v759_v37 = vpop.f32.mrf.mxu3 }
 0x3d8   :  { %v774_v44 = vadd.f32 0.5, %v771_v28  ;;  %v1262_v28 = vld [vmem:[#allocation5 + $0x38] sm:$0xff]  ;;  %v1260_v31 = vld [vmem:[#allocation5 + $0x28] sm:$0xff]  ;;  %v1259_v37 = vld [vmem:[#allocation5 + $0x20] sm:$0xff] }
 0x3d9   :  { %v775_v48 = vadd.f32 0.5, %v772_v29  ;;  %v1261_v29 = vld [vmem:[#allocation5 + $0x30] sm:$0xff] }
 0x3da   :  { %v1330_v49 = vpop.eup %1329 }
 0x3db   :  { %v778_v50 = vmul.f32 %v775_v48, %v1879_v25  ;;  %v779_v40 = vmul.f32 %v1330_v49, %v774_v44  ;;  %v1258_v44 = vld [vmem:[#allocation5 + $0x18] sm:$0xff]  ;;  %v1257_v48 = vld [vmem:[#allocation5 + $0x10] sm:$0xff]  ;;  %v1256_v49 = vld [vmem:[#allocation5 + $0x8] sm:$0xff] }
 0x3dc   :  { %v1332_v41 = vpop.eup %1331 }
 0x3dd   :  { %v780_v42 = vadd.f32 %v779_v40, %v778_v50  ;;  %v773_v43 = vmul.f32 0.5, %v1332_v41  ;;  %v1255_v50 = vld [vmem:[#allocation5] sm:$0xff]  ;;  %v875_v40 = vpop.permute.xlu1 %874 }
 0x3de   :  { %v877_v41 = vmul.f32 %v875_v40, %v1661_v53 }
 0x3df   :  { %1333 = vtanh.f32 %v780_v42  ;;  %v776_v52 = vadd.f32 0.5, %v773_v43 }
 0x3e5   :  { %v1334_v0 = vpop.eup %1333 }
 0x3e6   :  { %v782_v61 = vmul.f32 %v1334_v0, %v776_v52 }
 0x3e8   :  { %v783_v63 = vpack.c.bf16 %v782_v61, %v782_v61 }
 0x3ea   :  { %803 = vmatmul.bf16.vlgmr.msra.gmra.mxu0 %v783_v63  ;;  %816 = vmatmul.bf16.vlgmr.msra.gmra.mxu1 %v783_v63 }
 0x3eb   :  { %829 = vmatmul.bf16.vlgmr.msra.gmra.mxu2 %v783_v63  ;;  %842 = vmatmul.bf16.vlgmr.msra.gmra.mxu3 %v783_v63 }
 0x3ec   :  { %1024 = vmatpush.bf16.msra.mxu0 %v1262_v28 }
 0x3f0   :  { %1025 = vmatpush.bf16.msra.mxu0 %v1261_v29 }
 0x3f4   :  { %1026 = vmatpush.bf16.msra.mxu0 %v1260_v31 }
 0x3f8   :  { %1027 = vmatpush.bf16.msra.mxu0 %v1259_v37 }
 0x3fc   :  { %1028 = vmatpush.bf16.msra.mxu0 %v1258_v44 }
 0x400   :  { %1029 = vmatpush.bf16.msra.mxu0 %v1257_v48 }
 0x404   :  { %1030 = vmatpush.bf16.msra.mxu0 %v1256_v49 }
 0x408   :  { %1031 = vmatpush.bf16.msra.mxu0 %v1255_v50 }
 0x467   :  { %v804_v56 = vpop.f32.mrf.mxu0  ;;  %v817_v5 = vpop.f32.mrf.mxu1 }
 0x468   :  { %v805_v6 = vadd.f32 %v804_v56, %v791_v55  ;;  %v818_v11 = vadd.f32 %v817_v5, %v792_v58  ;;  %v879_v56 = vmul.f32 %v875_v40, %v1674_v7  ;;  %v880_v5 = vmul.f32 %v875_v40, %v1677_v15 }
 0x46a   :  { %v847_v16 = vadd.f32 %v805_v6, %v1670_v62  ;;  %v848_v19 = vadd.f32 %v818_v11, %v1672_v2 }
 0x46c   :  { %v851_v23 = vmul.f32 0.5, %v847_v16  ;;  %v852_v25 = vmul.f32 0.5, %v848_v19 }
 0x46e   :  { %1335 = vtanh.f32 %v851_v23  ;;  %v830_v36 = vpop.f32.mrf.mxu2  ;;  %v843_v21 = vpop.f32.mrf.mxu3 }
 0x46f   :  { %1337 = vtanh.f32 %v852_v25  ;;  %v831_v38 = vadd.f32 %v830_v36, %v793_v27  ;;  %v844_v4 = vadd.f32 %v843_v21, %v794_v33  ;;  %v806_v8 = vpop.f32.mrf.mxu0  ;;  %v819_v9 = vpop.f32.mrf.mxu1 }
 0x471   :  { %v849_v13 = vadd.f32 %v831_v38, %v1681_v24  ;;  %v850_v17 = vadd.f32 %v844_v4, %v1684_v32 }
 0x473   :  { %v853_v18 = vmul.f32 0.5, %v849_v13  ;;  %1339 = vtanh.f32 %v850_v17 }
 0x474   :  { %v1336_v22 = vpop.eup %1335 }
 0x475   :  { %v1338_v26 = vpop.eup %1337  ;;  %v857_v30 = vmul.f32 0.5, %v1336_v22  ;;  %1341 = vtanh.f32 %v853_v18 }
 0x476   :  { %v858_v34 = vmul.f32 0.5, %v1338_v26  ;;  %v832_v35 = vpop.f32.mrf.mxu2  ;;  %v845_v39 = vpop.f32.mrf.mxu3 }
 0x477   :  { %v860_v45 = vadd.f32 0.5, %v857_v30  ;;  %v1274_v30 = vld [vmem:[%s1950_s5] ss:$0 sm:$0xff] }
 0x478   :  { %v861_v46 = vadd.f32 0.5, %v858_v34 }
 0x479   :  { %v1340_v47 = vpop.eup %1339 }
 0x47a   :  { %v864_v51 = vmul.f32 %v861_v46, %v780_v42  ;;  %v865_v57 = vmul.f32 %v1340_v47, %v860_v45  ;;  %v878_v42 = vmul.f32 %v875_v40, %v1663_v54 }
 0x47b   :  { %v1342_v59 = vpop.eup %1341 }
 0x47c   :  { %v866_v60 = vadd.f32 %v865_v57, %v864_v51  ;;  %v859_v1 = vmul.f32 0.5, %v1342_v59 }
 0x47e   :  { %1343 = vtanh.f32 %v866_v60  ;;  %v862_v10 = vadd.f32 0.5, %v859_v1 }
 0x484   :  { %v1344_v12 = vpop.eup %1343 }
 0x485   :  { %v868_v14 = vmul.f32 %v1344_v12, %v862_v10 }
 0x487   :  { %v869_v20 = vpack.c.bf16 %v868_v14, %v868_v14 }
 0x489   :  { %889 = vmatmul.bf16.vlgmr.msrb.gmra.mxu0 %v869_v20  ;;  %902 = vmatmul.bf16.vlgmr.msrb.gmra.mxu1 %v869_v20 }
 0x48a   :  { %915 = vmatmul.bf16.vlgmr.msrb.gmra.mxu2 %v869_v20  ;;  %928 = vmatmul.bf16.vlgmr.msrb.gmra.mxu3 %v869_v20 }
 0x506   :  { %v890_v43 = vpop.f32.mrf.mxu0  ;;  %v903_v52 = vpop.f32.mrf.mxu1 }
 0x507   :  { %v891_v0 = vadd.f32 %v890_v43, %v877_v41  ;;  %v904_v61 = vadd.f32 %v903_v52, %v878_v42 }
 0x509   :  { %v933_v63 = vadd.f32 %v891_v0, %v1670_v62  ;;  %v934_v3 = vadd.f32 %v904_v61, %v1672_v2 }
 0x50b   :  { %v937_v55 = vmul.f32 0.5, %v933_v63  ;;  %v938_v58 = vmul.f32 0.5, %v934_v3 }
 0x50d   :  { %1345 = vtanh.f32 %v937_v55  ;;  %v916_v6 = vpop.f32.mrf.mxu2  ;;  %v929_v53 = vpop.f32.mrf.mxu3 }
 0x50e   :  { %1347 = vtanh.f32 %v938_v58  ;;  %v917_v54 = vadd.f32 %v916_v6, %v879_v56  ;;  %v930_v11 = vadd.f32 %v929_v53, %v880_v5  ;;  %v892_v16 = vpop.f32.mrf.mxu0  ;;  %v905_v19 = vpop.f32.mrf.mxu1 }
 0x510   :  { %v935_v23 = vadd.f32 %v917_v54, %v1681_v24  ;;  %v936_v62 = vadd.f32 %v930_v11, %v1684_v32 }
 0x512   :  { %v939_v25 = vmul.f32 0.5, %v935_v23  ;;  %1349 = vtanh.f32 %v936_v62 }
 0x513   :  { %v1346_v2 = vpop.eup %1345 }
 0x514   :  { %v1348_v27 = vpop.eup %1347  ;;  %v943_v33 = vmul.f32 0.5, %v1346_v2  ;;  %1351 = vtanh.f32 %v939_v25 }
 0x515   :  { %v944_v7 = vmul.f32 0.5, %v1348_v27  ;;  %v918_v15 = vpop.f32.mrf.mxu2  ;;  %v931_v36 = vpop.f32.mrf.mxu3 }
 0x516   :  { %v946_v21 = vadd.f32 0.5, %v943_v33 }
 0x517   :  { %v947_v38 = vadd.f32 0.5, %v944_v7 }
 0x518   :  { %v1350_v4 = vpop.eup %1349 }
 0x519   :  { %v950_v8 = vmul.f32 %v947_v38, %v866_v60  ;;  %v951_v9 = vmul.f32 %v1350_v4, %v946_v21 }
 0x51a   :  { %v1352_v13 = vpop.eup %1351 }
 0x51b   :  { %v952_v17 = vadd.f32 %v951_v9, %v950_v8  ;;  %v945_v24 = vmul.f32 0.5, %v1352_v13 }
 0x51d   :  { %1353 = vtanh.f32 %v952_v17  ;;  %v948_v18 = vadd.f32 0.5, %v945_v24 }
 0x523   :  { %v1354_v32 = vpop.eup %1353 }
 0x524   :  { %v954_v22 = vmul.f32 %v1354_v32, %v948_v18 }
 0x526   :  { %v955_v26 = vpack.c.bf16 %v954_v22, %v954_v22 }
 0x528   :  { %1032 = vmatmul.bf16.vlgmr.msra.gmra.mxu0 %v955_v26 }
 0x5a5   :  { %v1033_v34 = vpop.f32.mrf.mxu0 }
 0x5a6   :  { %v1034_v35 = vadd.f32 %v1274_v30, %v1033_v34 }
 0x5a8   :  { %1037 = vst [vmem:[#allocation7] sm:$0x3] %v1034_v35 }
 0x5a9   :  { %1048 = dma.vmem_to_hbm [thread:$0]  %s1044_s29, 32, %s1046_s8, [#allocation4]  }
 0x5ad   :  { %v1035_v39 = vpop.f32.mrf.mxu0 }
 0x5ae   :  { %1431 = dma.done.wait [#allocation4], 32  }
 0x5af   :  { %1432 = vsyncadd [#allocation4], 4294967264 }
 0x5b0   :  { %1053 = vsyncpa [#allocation3], 1 }
 0x5b1   :  { %1054 = vsyncpa [#allocation6], 1 }
 0x5b2   :  { %1055 = vsyncpa [#allocation4], 1 }

</bundles_post_ra>
